<compile_context>
chip_gen: v6e
topology: v6e:2x2x1
jax: 0.10.0
libtpu: 0.0.40
codegen_flags: <defaults>
</compile_context>

<pallas_src>
import math
import functools

import jax
import jax.numpy as jnp
from jax.experimental import pallas as pl
from jax.experimental.pallas import tpu as pltpu


# ----------------------------- feature probes --------------------------------

def _probe_buffered():
    """Detect pipeline_mode=pl.Buffered support once at import (no execution)."""
    if not hasattr(pl, "Buffered"):
        return False
    try:
        pl.BlockSpec((8, 128), lambda b, t: (0, 0), pipeline_mode=pl.Buffered(1))
        return True
    except TypeError:
        return False


_HAS_BUFFERED = _probe_buffered()


def _default_vmem_limit_bytes():
    """~75% of physical VMEM (raises the 16/32 MiB scoped defaults, stays under
    v7x's 64 MiB physical).  Falls back to 48 MiB if the query is unavailable."""
    try:
        cap = int(pltpu.get_tpu_info().vmem_capacity_bytes)
        if cap <= 0:
            raise ValueError
    except Exception:
        return 48 * 1024 * 1024
    return (cap * 3) // 4


# ----------------------------- shared math helpers ---------------------------

def _layer_norm(v, g, b, eps=1e-6):
    # The PyTorch module sets eps=1e-6 on every LayerNorm.
    mu = jnp.mean(v, axis=-1, keepdims=True)
    xc = v - mu
    var = jnp.mean(xc * xc, axis=-1, keepdims=True)
    return xc * jax.lax.rsqrt(var + eps) * g + b


def _mm_bf16(a, w):
    """Matmul with bf16 operands and f32 accumulation (MXU-friendly)."""
    return jax.lax.dot_general(
        a.astype(jnp.bfloat16), w.astype(jnp.bfloat16),
        (((a.ndim - 1,), (0,)), ((), ())),
        preferred_element_type=jnp.float32)


# ------------------------------- kernel body ---------------------------------

def _attention(q_src, wq, bq, wo, bo, k_ref, v_ref, bias, pmult,
               num_heads, head_size):
    """Multi-head attention for one query tile against cached K/V.

    q_src: [Tq, D] f32 (already layer-normed query source).
    k_ref/v_ref: VMEM scratch [Tk, D] bf16 (filled once per batch).
    bias:  additive 0/-inf, [1, Tk] or [Tq, Tk] f32, or None.
    pmult: multiplicative 0/1 post-softmax padding mask, same shapes, or None.
    """
    bf = jnp.bfloat16
    scale = 1.0 / math.sqrt(head_size)
    q = ((_mm_bf16(q_src, wq) + bq) * scale).astype(bf)        # [Tq, D]

    ctxs = []
    for h in range(num_heads):
        sl = slice(h * head_size, (h + 1) * head_size)
        s = jax.lax.dot_general(                               # [Tq, Tk]
            q[:, sl], k_ref[:, sl],
            (((1,), (1,)), ((), ())),
            preferred_element_type=jnp.float32)
        if bias is not None:
            s = s + bias
        m = jnp.max(s, axis=-1, keepdims=True)
        e = jnp.exp(s - m)
        # Denominator BEFORE the padding mask (torch masks after softmax).
        denom = jnp.sum(e, axis=-1, keepdims=True)
        if pmult is not None:
            e = e * pmult
        ctx = jax.lax.dot_general(                             # [Tq, hd]
            e.astype(bf), v_ref[:, sl],
            (((1,), (0,)), ((), ())),
            preferred_element_type=jnp.float32)
        # Deferred softmax normalization: one [Tq,1] reciprocal instead of a
        # [Tq,Tk] divide; mathematically identical to softmax(s) @ v.
        ctxs.append(ctx * (1.0 / denom))

    ctx_all = jnp.concatenate(ctxs, axis=-1)                   # [Tq, D]
    return _mm_bf16(ctx_all, wo) + bo


def decoder_layer_kernel(*refs, num_heads, head_size, has_self, has_tbias,
                         has_pmult, has_sbias, causal_trg):
    f32 = jnp.float32
    bf = jnp.bfloat16

    n_scratch = 4 if has_self else 2
    scratch = refs[len(refs) - n_scratch:]
    o_ref = refs[len(refs) - n_scratch - 2]
    h2_ref = refs[len(refs) - n_scratch - 1]
    ins = iter(refs[:len(refs) - n_scratch - 2])

    # ------ inputs -----------------------------------------------------------
    x_t = next(ins)[0].astype(f32)                             # [Tt, D]
    x_full_ref = next(ins) if has_self else None               # [1, T, D]
    mem_ref = next(ins)                                        # [1, S, D]
    tbias = next(ins)[0].astype(f32) if has_tbias else None    # [1|Tt, T]
    pmult = next(ins)[0].astype(f32) if has_pmult else None    # [1|Tt, T]
    sbias = next(ins)[0].astype(f32) if has_sbias else None    # [1|Tt, S]

    xln_g = next(ins)[...]; xln_b = next(ins)[...]
    t_w = [next(ins)[...] for _ in range(8)] if has_self else None
    dln_g = next(ins)[...]; dln_b = next(ins)[...]
    s_w = [next(ins)[...] for _ in range(8)]                   # wq,bq,wk,bk,wv,bv,wo,bo
    fln_g = next(ins)[...]; fln_b = next(ins)[...]
    w1 = next(ins)[...]; b1 = next(ins)[...]
    w2 = next(ins)[...]; b2 = next(ins)[...]

    if has_self:
        ks_ref, vs_ref, kc_ref, vc_ref = scratch
    else:
        kc_ref, vc_ref = scratch

    # ------ per-batch K/V cache (filled on the first query tile only) --------
    @pl.when(pl.program_id(1) == 0)
    def _fill_kv():
        mem = mem_ref[0].astype(f32)
        kc_ref[...] = (_mm_bf16(mem, s_w[2]) + s_w[3]).astype(bf)
        vc_ref[...] = (_mm_bf16(mem, s_w[4]) + s_w[5]).astype(bf)
        if has_self:
            kv = _layer_norm(x_full_ref[0].astype(f32), xln_g, xln_b)
            ks_ref[...] = (_mm_bf16(kv, t_w[2]) + t_w[3]).astype(bf)
            vs_ref[...] = (_mm_bf16(kv, t_w[4]) + t_w[5]).astype(bf)

    # ------ self-attention block: h1 = selfattn(LN(x)) + x -------------------
    # TODO(synk): all nn.Dropout layers are treated as identity (eval mode).
    h1 = _layer_norm(x_t, xln_g, xln_b)
    if has_self:
        if causal_trg:
            # Generate the causal additive bias in-kernel (no mask DMA).
            tt = x_t.shape[0]
            tk = ks_ref.shape[0]
            row = (pl.program_id(1) * tt
                   + jax.lax.broadcasted_iota(jnp.int32, (tt, tk), 0))
            col = jax.lax.broadcasted_iota(jnp.int32, (tt, tk), 1)
            tb = jnp.where(col <= row, 0.0, -jnp.inf).astype(f32)
        else:
            tb = tbias
        h1 = _attention(h1, t_w[0], t_w[1], t_w[6], t_w[7],
                        ks_ref, vs_ref, tb, pmult, num_heads, head_size)
    h1 = h1 + x_t

    # ------ cross-attention block: h2 = crossattn(memory, memory, LN(h1)) ----
    h1n = _layer_norm(h1, dln_g, dln_b)
    h2 = _attention(h1n, s_w[0], s_w[1], s_w[6], s_w[7],
                    kc_ref, vc_ref, sbias, None, num_heads, head_size)

    # ------ position-wise FFN: o = W2(ReLU(W1(LN(y)))) + y,  y = h2 + h1 ------
    y = h2 + h1
    yn = _layer_norm(y, fln_g, fln_b)
    f = jnp.maximum(_mm_bf16(yn, w1) + b1, 0.0).astype(bf)     # bf16 intermediate
    o = _mm_bf16(f, w2) + b2 + y

    o_ref[0] = o.astype(o_ref.dtype)
    h2_ref[0] = h2.astype(h2_ref.dtype)


# ------------------------------ python wrapper --------------------------------

def run_decoder_layer(x, memory, params, src_mask=None, trg_mask=None,
                      padding_mask=None, num_heads=4, decoder_trg_trg=True,
                      causal_trg_mask=False, q_tile=256, vmem_limit_bytes=None):
    B, T, D = x.shape
    S = memory.shape[1]
    H = num_heads
    hd = D // H
    f32, bf16 = jnp.float32, jnp.bfloat16

    # query-tile size (second-minor block dim must divide by 8 or be full T)
    T_TILE = T if T <= q_tile else max(8, (q_tile // 8) * 8)
    nT = pl.cdiv(T, T_TILE)

    has_self = bool(decoder_trg_trg)
    causal_trg = bool(causal_trg_mask) and has_self
    has_tbias = has_self and (trg_mask is not None) and not causal_trg
    has_pmult = has_self and (padding_mask is not None)
    has_sbias = src_mask is not None

    def compact_mask(mask, tk, to_bias):
        """Head-invariant mask -> [B, 1|T, tk] bf16 (0/-inf bias or 0/1 mult)."""
        m = jnp.asarray(mask)
        if m.ndim != 4 or m.shape[1] != 1:
            raise ValueError("only head-invariant 4-D masks are supported")
        qdim = 1 if m.shape[2] == 1 else T
        m = jnp.broadcast_to(m, (B, 1, qdim, tk))[:, 0]
        if to_bias:
            return jnp.where(m, 0.0, -jnp.inf).astype(bf16)
        return m.astype(bf16)

    def mask_spec(qdim, tk):
        if qdim == 1:           # key-only mask: tiny, DMA'd once per batch
            return pl.BlockSpec((1, 1, tk), lambda b, t: (b, 0, 0))
        return pl.BlockSpec((1, T_TILE, tk), lambda b, t: (b, t, 0))

    # ---- data inputs (only what is actually needed is shipped) ----
    data_inputs = [x]
    data_specs = [pl.BlockSpec((1, T_TILE, D), lambda b, t: (b, t, 0))]
    if has_self:
        # full sequence, K/V source of self-attention (DMA'd once per batch)
        data_inputs.append(x)
        data_specs.append(pl.BlockSpec((1, T, D), lambda b, t: (b, 0, 0)))
    data_inputs.append(memory)
    data_specs.append(pl.BlockSpec((1, S, D), lambda b, t: (b, 0, 0)))
    if has_tbias:
        tb = compact_mask(trg_mask, T, to_bias=True)
        data_inputs.append(tb)
        data_specs.append(mask_spec(tb.shape[1], T))
    if has_pmult:
        pm = compact_mask(padding_mask, T, to_bias=False)
        data_inputs.append(pm)
        data_specs.append(mask_spec(pm.shape[1], T))
    if has_sbias:
        sb = compact_mask(src_mask, S, to_bias=True)
        data_inputs.append(sb)
        data_specs.append(mask_spec(sb.shape[1], S))

    # ---- weights (matrices pre-cast to bf16, biases/LN params kept f32) ----
    def wmat(w):
        return jnp.asarray(w, bf16)

    def wvec(v):
        return jnp.asarray(v, f32).reshape(1, -1)

    def att_weights(p):
        return [wmat(p["wq"]), wvec(p["bq"]), wmat(p["wk"]), wvec(p["bk"]),
                wmat(p["wv"]), wvec(p["bv"]), wmat(p["wo"]), wvec(p["bo"])]

    weight_args = [wvec(params["xln_g"]), wvec(params["xln_b"])]
    if has_self:
        weight_args += att_weights(params["trg"])
    weight_args += [wvec(params["dln_g"]), wvec(params["dln_b"])]
    weight_args += att_weights(params["src"])
    weight_args += [wvec(params["fln_g"]), wvec(params["fln_b"]),
                    wmat(params["w1"]), wvec(params["b1"]),
                    wmat(params["w2"]), wvec(params["b2"])]

    def weight_spec(arr):
        idx = (lambda b, t, _n=arr.ndim: (0,) * _n)
        if _HAS_BUFFERED:
            # grid-invariant weights: one VMEM buffer is enough.
            return pl.BlockSpec(arr.shape, idx, pipeline_mode=pl.Buffered(1))
        return pl.BlockSpec(arr.shape, idx)

    in_specs = data_specs + [weight_spec(w) for w in weight_args]
    out_block = pl.BlockSpec((1, T_TILE, D), lambda b, t: (b, t, 0))

    scratch_shapes = []
    if has_self:
        scratch_shapes += [pltpu.VMEM((T, D), bf16), pltpu.VMEM((T, D), bf16)]
    scratch_shapes += [pltpu.VMEM((S, D), bf16), pltpu.VMEM((S, D), bf16)]

    if vmem_limit_bytes is None:
        vmem_limit_bytes = _default_vmem_limit_bytes()

    kernel = functools.partial(
        decoder_layer_kernel, num_heads=H, head_size=hd,
        has_self=has_self, has_tbias=has_tbias,
        has_pmult=has_pmult, has_sbias=has_sbias, causal_trg=causal_trg)

    fn = pl.pallas_call(
        kernel,
        out_shape=[jax.ShapeDtypeStruct((B, T, D), x.dtype),
                   jax.ShapeDtypeStruct((B, T, D), x.dtype)],
        grid_spec=pltpu.PrefetchScalarGridSpec(
            num_scalar_prefetch=0,
            grid=(B, nT),
            in_specs=in_specs,
            out_specs=[out_block, out_block],
            scratch_shapes=scratch_shapes),
        compiler_params=pltpu.CompilerParams(
            # Query-tile axis caches K/V in scratch across iterations, so it
            # must be "arbitrary"; batch stays outer/"parallel" for megacore.
            dimension_semantics=("parallel", "arbitrary"),
            vmem_limit_bytes=int(vmem_limit_bytes)),
    )
    # TODO(synk): causal key-tile skipping for long sequences (inner key loop)
    # is not implemented; every query tile scans all cached keys.
    return fn(*data_inputs, *weight_args)


# ----------------------------- pure-JAX reference -----------------------------
# Mirrors the PyTorch module op-for-op (softmax before the context matmul,
# boolean masks, f32 mask application) with the same bf16-operand / f32-accum
# matmul policy as the kernel.

def _ref_mha(kv, q_in, p, H, mask=None, padding_mask=None):
    B, Tq, D = q_in.shape
    S = kv.shape[1]
    hd = D // H
    bf = jnp.bfloat16
    scale = 1.0 / math.sqrt(hd)
    q = (_mm_bf16(q_in, p["wq"]) + p["bq"]) * scale
    k = _mm_bf16(kv, p["wk"]) + p["bk"]
    v = _mm_bf16(kv, p["wv"]) + p["bv"]
    q = q.reshape(B, Tq, H, hd).transpose(0, 2, 1, 3)
    k = k.reshape(B, S, H, hd).transpose(0, 2, 1, 3)
    v = v.reshape(B, S, H, hd).transpose(0, 2, 1, 3)
    scores = jnp.einsum("bhqd,bhkd->bhqk", q.astype(bf), k.astype(bf),
                        preferred_element_type=jnp.float32)
    if mask is not None:
        scores = jnp.where(jnp.broadcast_to(mask, scores.shape), scores, -jnp.inf)
    m = jnp.max(scores, axis=-1, keepdims=True)
    e = jnp.exp(scores - m)
    att = e / jnp.sum(e, axis=-1, keepdims=True)
    if padding_mask is not None:
        att = jnp.where(jnp.broadcast_to(padding_mask, att.shape), att, 0.0)
    ctx = jnp.einsum("bhqk,bhkd->bhqd", att.astype(bf), v.astype(bf),
                     preferred_element_type=jnp.float32)
    ctx = ctx.transpose(0, 2, 1, 3).reshape(B, Tq, D)
    return _mm_bf16(ctx, p["wo"]) + p["bo"]


def ref_decoder_layer(x, memory, params, src_mask, trg_mask, padding_mask, H,
                      decoder_trg_trg=True):
    h1 = _layer_norm(x, params["xln_g"], params["xln_b"])
    if decoder_trg_trg:
        h1 = _ref_mha(h1, h1, params["trg"], H, trg_mask, padding_mask)
    h1 = h1 + x
    h1n = _layer_norm(h1, params["dln_g"], params["dln_b"])
    h2 = _ref_mha(memory, h1n, params["src"], H, src_mask, None)
    y = h2 + h1
    yn = _layer_norm(y, params["fln_g"], params["fln_b"])
    f = jnp.maximum(_mm_bf16(yn, params["w1"]) + params["b1"], 0.0)
    o = _mm_bf16(f, params["w2"]) + params["b2"] + y
    return o, h2


# --------------------------------- params -------------------------------------

def init_params(key, D, F):
    keys = iter(jax.random.split(key, 24))

    def lin(kin, kout):
        s = 1.0 / math.sqrt(kin)
        w = jax.random.uniform(next(keys), (kin, kout), jnp.float32, -s, s)
        b = jax.random.uniform(next(keys), (kout,), jnp.float32, -s, s)
        return w, b

    def att():
        p = {}
        for name in ("q", "k", "v", "o"):
            w, b = lin(D, D)
            p["w" + name] = w
            p["b" + name] = b
        return p

    params = {"trg": att(), "src": att()}
    params["w1"], params["b1"] = lin(D, F)
    params["w2"], params["b2"] = lin(F, D)
    for n in ("xln", "dln", "fln"):
        params[n + "_g"] = jnp.ones((D,), jnp.float32)
        params[n + "_b"] = jnp.zeros((D,), jnp.float32)
    return params


# ----------------------------------- main --------------------------------------

if __name__ == "__main__":
    B, T, S, D, H, F = 2, 8, 8, 32, 4, 64

    key = jax.random.PRNGKey(0)
    kx, km, kp = jax.random.split(key, 3)
    x = jax.random.normal(kx, (B, T, D), jnp.float32)
    memory = jax.random.normal(km, (B, S, D), jnp.float32)
    params = init_params(kp, D, F)

    # causal target mask [B, 1, T, T]; source mask [B, 1, 1, S] with padding.
    trg_mask = jnp.broadcast_to(jnp.tril(jnp.ones((T, T), jnp.bool_)), (B, 1, T, T))
    src_valid = jnp.stack([
        jnp.ones((S,), jnp.bool_),
        jnp.arange(S) < S - 2,
    ])
    src_mask = src_valid[:, None, None, :]

    # Tolerances: the kernel uses bf16 matmul operands and flash-style deferred
    # softmax normalization; the reference uses the literal torch op order, so
    # small (<1e-2) element-wise differences are expected.
    TOL = dict(atol=1e-2, rtol=1e-2)

    # --- config 1: causal trg bias generated in-kernel + src key mask ---
    o1, h21 = run_decoder_layer(x, memory, params,
                                src_mask=src_mask, trg_mask=trg_mask,
                                padding_mask=None, num_heads=H,
                                decoder_trg_trg=True, causal_trg_mask=True)
    jax.block_until_ready((o1, h21))
    o1_ref, h21_ref = ref_decoder_layer(x, memory, params, src_mask, trg_mask,
                                        None, H, decoder_trg_trg=True)
    assert o1.shape == (B, T, D) and h21.shape == (B, T, D)
    assert jnp.allclose(o1, o1_ref, **TOL), "output mismatch (causal)"
    assert jnp.allclose(h21, h21_ref, **TOL), "h2 mismatch (causal)"

    # --- config 2: dense trg-mask path + post-softmax padding mask ---
    padding_mask = (jnp.arange(T) < T - 1)[None, None, None, :]   # mask last key
    o2, h22 = run_decoder_layer(x, memory, params,
                                src_mask=src_mask, trg_mask=trg_mask,
                                padding_mask=padding_mask, num_heads=H,
                                decoder_trg_trg=True, causal_trg_mask=False)
    jax.block_until_ready((o2, h22))
    o2_ref, h22_ref = ref_decoder_layer(x, memory, params, src_mask, trg_mask,
                                        padding_mask, H, decoder_trg_trg=True)
    assert jnp.allclose(o2, o2_ref, **TOL), "output mismatch (pad)"
    assert jnp.allclose(h22, h22_ref, **TOL), "h2 mismatch (pad)"

    print("KERNEL_OK")
</pallas_src>

<mosaic_0001>
module attributes {stable_mosaic.version = 11 : i64} {
  func.func @decoder_layer_kernel(%arg0: i32, %arg1: i32, %arg2: memref<1x8x32xf32, #tpu.memory_space<vmem>>, %arg3: memref<1x8x32xf32, #tpu.memory_space<vmem>>, %arg4: memref<1x8x32xf32, #tpu.memory_space<vmem>>, %arg5: memref<1x1x8xbf16, #tpu.memory_space<vmem>>, %arg6: memref<1x32xf32, #tpu.memory_space<vmem>>, %arg7: memref<1x32xf32, #tpu.memory_space<vmem>>, %arg8: memref<32x32xbf16, #tpu.memory_space<vmem>>, %arg9: memref<1x32xf32, #tpu.memory_space<vmem>>, %arg10: memref<32x32xbf16, #tpu.memory_space<vmem>>, %arg11: memref<1x32xf32, #tpu.memory_space<vmem>>, %arg12: memref<32x32xbf16, #tpu.memory_space<vmem>>, %arg13: memref<1x32xf32, #tpu.memory_space<vmem>>, %arg14: memref<32x32xbf16, #tpu.memory_space<vmem>>, %arg15: memref<1x32xf32, #tpu.memory_space<vmem>>, %arg16: memref<1x32xf32, #tpu.memory_space<vmem>>, %arg17: memref<1x32xf32, #tpu.memory_space<vmem>>, %arg18: memref<32x32xbf16, #tpu.memory_space<vmem>>, %arg19: memref<1x32xf32, #tpu.memory_space<vmem>>, %arg20: memref<32x32xbf16, #tpu.memory_space<vmem>>, %arg21: memref<1x32xf32, #tpu.memory_space<vmem>>, %arg22: memref<32x32xbf16, #tpu.memory_space<vmem>>, %arg23: memref<1x32xf32, #tpu.memory_space<vmem>>, %arg24: memref<32x32xbf16, #tpu.memory_space<vmem>>, %arg25: memref<1x32xf32, #tpu.memory_space<vmem>>, %arg26: memref<1x32xf32, #tpu.memory_space<vmem>>, %arg27: memref<1x32xf32, #tpu.memory_space<vmem>>, %arg28: memref<32x64xbf16, #tpu.memory_space<vmem>>, %arg29: memref<1x64xf32, #tpu.memory_space<vmem>>, %arg30: memref<64x32xbf16, #tpu.memory_space<vmem>>, %arg31: memref<1x32xf32, #tpu.memory_space<vmem>>, %arg32: memref<1x8x32xf32, #tpu.memory_space<vmem>>, %arg33: memref<1x8x32xf32, #tpu.memory_space<vmem>>, %arg34: memref<8x32xbf16, #tpu.memory_space<vmem>>, %arg35: memref<8x32xbf16, #tpu.memory_space<vmem>>, %arg36: memref<8x32xbf16, #tpu.memory_space<vmem>>, %arg37: memref<8x32xbf16, #tpu.memory_space<vmem>>) attributes {dimension_semantics = [#tpu.dimension_semantics<parallel>, #tpu.dimension_semantics<arbitrary>], iteration_bounds = array<i64: 2, 1>, scalar_prefetch = 0 : i64, scratch_operands = 4 : i64, tpu.core_type = #tpu.core_type<tc>, window_params = [{transform_indices = @transform_0, window_bounds = array<i64: 1, 8, 32>}, {transform_indices = @transform_1, window_bounds = array<i64: 1, 8, 32>}, {transform_indices = @transform_2, window_bounds = array<i64: 1, 8, 32>}, {transform_indices = @transform_3, window_bounds = array<i64: 1, 1, 8>}, {pipeline_mode = #tpu.pipeline_mode<synchronous>, transform_indices = @transform_4, window_bounds = array<i64: 1, 32>}, {pipeline_mode = #tpu.pipeline_mode<synchronous>, transform_indices = @transform_5, window_bounds = array<i64: 1, 32>}, {pipeline_mode = #tpu.pipeline_mode<synchronous>, transform_indices = @transform_6, window_bounds = array<i64: 32, 32>}, {pipeline_mode = #tpu.pipeline_mode<synchronous>, transform_indices = @transform_7, window_bounds = array<i64: 1, 32>}, {pipeline_mode = #tpu.pipeline_mode<synchronous>, transform_indices = @transform_8, window_bounds = array<i64: 32, 32>}, {pipeline_mode = #tpu.pipeline_mode<synchronous>, transform_indices = @transform_9, window_bounds = array<i64: 1, 32>}, {pipeline_mode = #tpu.pipeline_mode<synchronous>, transform_indices = @transform_10, window_bounds = array<i64: 32, 32>}, {pipeline_mode = #tpu.pipeline_mode<synchronous>, transform_indices = @transform_11, window_bounds = array<i64: 1, 32>}, {pipeline_mode = #tpu.pipeline_mode<synchronous>, transform_indices = @transform_12, window_bounds = array<i64: 32, 32>}, {pipeline_mode = #tpu.pipeline_mode<synchronous>, transform_indices = @transform_13, window_bounds = array<i64: 1, 32>}, {pipeline_mode = #tpu.pipeline_mode<synchronous>, transform_indices = @transform_14, window_bounds = array<i64: 1, 32>}, {pipeline_mode = #tpu.pipeline_mode<synchronous>, transform_indices = @transform_15, window_bounds = array<i64: 1, 32>}, {pipeline_mode = #tpu.pipeline_mode<synchronous>, transform_indices = @transform_16, window_bounds = array<i64: 32, 32>}, {pipeline_mode = #tpu.pipeline_mode<synchronous>, transform_indices = @transform_17, window_bounds = array<i64: 1, 32>}, {pipeline_mode = #tpu.pipeline_mode<synchronous>, transform_indices = @transform_18, window_bounds = array<i64: 32, 32>}, {pipeline_mode = #tpu.pipeline_mode<synchronous>, transform_indices = @transform_19, window_bounds = array<i64: 1, 32>}, {pipeline_mode = #tpu.pipeline_mode<synchronous>, transform_indices = @transform_20, window_bounds = array<i64: 32, 32>}, {pipeline_mode = #tpu.pipeline_mode<synchronous>, transform_indices = @transform_21, window_bounds = array<i64: 1, 32>}, {pipeline_mode = #tpu.pipeline_mode<synchronous>, transform_indices = @transform_22, window_bounds = array<i64: 32, 32>}, {pipeline_mode = #tpu.pipeline_mode<synchronous>, transform_indices = @transform_23, window_bounds = array<i64: 1, 32>}, {pipeline_mode = #tpu.pipeline_mode<synchronous>, transform_indices = @transform_24, window_bounds = array<i64: 1, 32>}, {pipeline_mode = #tpu.pipeline_mode<synchronous>, transform_indices = @transform_25, window_bounds = array<i64: 1, 32>}, {pipeline_mode = #tpu.pipeline_mode<synchronous>, transform_indices = @transform_26, window_bounds = array<i64: 32, 64>}, {pipeline_mode = #tpu.pipeline_mode<synchronous>, transform_indices = @transform_27, window_bounds = array<i64: 1, 64>}, {pipeline_mode = #tpu.pipeline_mode<synchronous>, transform_indices = @transform_28, window_bounds = array<i64: 64, 32>}, {pipeline_mode = #tpu.pipeline_mode<synchronous>, transform_indices = @transform_29, window_bounds = array<i64: 1, 32>}, {transform_indices = @transform_30, window_bounds = array<i64: 1, 8, 32>}, {transform_indices = @transform_31, window_bounds = array<i64: 1, 8, 32>}]} {
    %c0 = arith.constant 0 : index
    %c0_0 = arith.constant 0 : index
    %c0_1 = arith.constant 0 : index
    %0 = vector.load %arg2[%c0, %c0_0, %c0_1] : memref<1x8x32xf32, #tpu.memory_space<vmem>>, vector<1x8x32xf32>
    %1 = vector.shape_cast %0 : vector<1x8x32xf32> to vector<8x32xf32>
    %c0_2 = arith.constant 0 : index
    %c0_3 = arith.constant 0 : index
    %c0_4 = arith.constant 0 : index
    %2 = vector.load %arg5[%c0_2, %c0_3, %c0_4] : memref<1x1x8xbf16, #tpu.memory_space<vmem>>, vector<1x1x8xbf16>
    %3 = vector.shape_cast %2 : vector<1x1x8xbf16> to vector<1x8xbf16>
    %4 = arith.extf %3 : vector<1x8xbf16> to vector<1x8xf32>
    %c0_5 = arith.constant 0 : index
    %c0_6 = arith.constant 0 : index
    %5 = vector.load %arg6[%c0_5, %c0_6] : memref<1x32xf32, #tpu.memory_space<vmem>>, vector<1x32xf32>
    %c0_7 = arith.constant 0 : index
    %c0_8 = arith.constant 0 : index
    %6 = vector.load %arg7[%c0_7, %c0_8] : memref<1x32xf32, #tpu.memory_space<vmem>>, vector<1x32xf32>
    %c0_9 = arith.constant 0 : index
    %c0_10 = arith.constant 0 : index
    %7 = vector.load %arg8[%c0_9, %c0_10] : memref<32x32xbf16, #tpu.memory_space<vmem>>, vector<32x32xbf16>
    %c0_11 = arith.constant 0 : index
    %c0_12 = arith.constant 0 : index
    %8 = vector.load %arg9[%c0_11, %c0_12] : memref<1x32xf32, #tpu.memory_space<vmem>>, vector<1x32xf32>
    %c0_13 = arith.constant 0 : index
    %c0_14 = arith.constant 0 : index
    %9 = vector.load %arg10[%c0_13, %c0_14] : memref<32x32xbf16, #tpu.memory_space<vmem>>, vector<32x32xbf16>
    %c0_15 = arith.constant 0 : index
    %c0_16 = arith.constant 0 : index
    %10 = vector.load %arg11[%c0_15, %c0_16] : memref<1x32xf32, #tpu.memory_space<vmem>>, vector<1x32xf32>
    %c0_17 = arith.constant 0 : index
    %c0_18 = arith.constant 0 : index
    %11 = vector.load %arg12[%c0_17, %c0_18] : memref<32x32xbf16, #tpu.memory_space<vmem>>, vector<32x32xbf16>
    %c0_19 = arith.constant 0 : index
    %c0_20 = arith.constant 0 : index
    %12 = vector.load %arg13[%c0_19, %c0_20] : memref<1x32xf32, #tpu.memory_space<vmem>>, vector<1x32xf32>
    %c0_21 = arith.constant 0 : index
    %c0_22 = arith.constant 0 : index
    %13 = vector.load %arg14[%c0_21, %c0_22] : memref<32x32xbf16, #tpu.memory_space<vmem>>, vector<32x32xbf16>
    %c0_23 = arith.constant 0 : index
    %c0_24 = arith.constant 0 : index
    %14 = vector.load %arg15[%c0_23, %c0_24] : memref<1x32xf32, #tpu.memory_space<vmem>>, vector<1x32xf32>
    %c0_25 = arith.constant 0 : index
    %c0_26 = arith.constant 0 : index
    %15 = vector.load %arg16[%c0_25, %c0_26] : memref<1x32xf32, #tpu.memory_space<vmem>>, vector<1x32xf32>
    %c0_27 = arith.constant 0 : index
    %c0_28 = arith.constant 0 : index
    %16 = vector.load %arg17[%c0_27, %c0_28] : memref<1x32xf32, #tpu.memory_space<vmem>>, vector<1x32xf32>
    %c0_29 = arith.constant 0 : index
    %c0_30 = arith.constant 0 : index
    %17 = vector.load %arg18[%c0_29, %c0_30] : memref<32x32xbf16, #tpu.memory_space<vmem>>, vector<32x32xbf16>
    %c0_31 = arith.constant 0 : index
    %c0_32 = arith.constant 0 : index
    %18 = vector.load %arg19[%c0_31, %c0_32] : memref<1x32xf32, #tpu.memory_space<vmem>>, vector<1x32xf32>
    %c0_33 = arith.constant 0 : index
    %c0_34 = arith.constant 0 : index
    %19 = vector.load %arg20[%c0_33, %c0_34] : memref<32x32xbf16, #tpu.memory_space<vmem>>, vector<32x32xbf16>
    %c0_35 = arith.constant 0 : index
    %c0_36 = arith.constant 0 : index
    %20 = vector.load %arg21[%c0_35, %c0_36] : memref<1x32xf32, #tpu.memory_space<vmem>>, vector<1x32xf32>
    %c0_37 = arith.constant 0 : index
    %c0_38 = arith.constant 0 : index
    %21 = vector.load %arg22[%c0_37, %c0_38] : memref<32x32xbf16, #tpu.memory_space<vmem>>, vector<32x32xbf16>
    %c0_39 = arith.constant 0 : index
    %c0_40 = arith.constant 0 : index
    %22 = vector.load %arg23[%c0_39, %c0_40] : memref<1x32xf32, #tpu.memory_space<vmem>>, vector<1x32xf32>
    %c0_41 = arith.constant 0 : index
    %c0_42 = arith.constant 0 : index
    %23 = vector.load %arg24[%c0_41, %c0_42] : memref<32x32xbf16, #tpu.memory_space<vmem>>, vector<32x32xbf16>
    %c0_43 = arith.constant 0 : index
    %c0_44 = arith.constant 0 : index
    %24 = vector.load %arg25[%c0_43, %c0_44] : memref<1x32xf32, #tpu.memory_space<vmem>>, vector<1x32xf32>
    %c0_45 = arith.constant 0 : index
    %c0_46 = arith.constant 0 : index
    %25 = vector.load %arg26[%c0_45, %c0_46] : memref<1x32xf32, #tpu.memory_space<vmem>>, vector<1x32xf32>
    %c0_47 = arith.constant 0 : index
    %c0_48 = arith.constant 0 : index
    %26 = vector.load %arg27[%c0_47, %c0_48] : memref<1x32xf32, #tpu.memory_space<vmem>>, vector<1x32xf32>
    %c0_49 = arith.constant 0 : index
    %c0_50 = arith.constant 0 : index
    %27 = vector.load %arg28[%c0_49, %c0_50] : memref<32x64xbf16, #tpu.memory_space<vmem>>, vector<32x64xbf16>
    %c0_51 = arith.constant 0 : index
    %c0_52 = arith.constant 0 : index
    %28 = vector.load %arg29[%c0_51, %c0_52] : memref<1x64xf32, #tpu.memory_space<vmem>>, vector<1x64xf32>
    %c0_53 = arith.constant 0 : index
    %c0_54 = arith.constant 0 : index
    %29 = vector.load %arg30[%c0_53, %c0_54] : memref<64x32xbf16, #tpu.memory_space<vmem>>, vector<64x32xbf16>
    %c0_55 = arith.constant 0 : index
    %c0_56 = arith.constant 0 : index
    %30 = vector.load %arg31[%c0_55, %c0_56] : memref<1x32xf32, #tpu.memory_space<vmem>>, vector<1x32xf32>
    %c0_i32 = arith.constant 0 : i32
    %31 = arith.cmpi eq, %arg1, %c0_i32 : i32
    %32 = arith.extui %31 : i1 to i32
    %c0_i32_57 = arith.constant 0 : i32
    %33 = arith.cmpi ne, %32, %c0_i32_57 : i32
    scf.if %33 {
      %c0_158 = arith.constant 0 : index
      %c0_159 = arith.constant 0 : index
      %c0_160 = arith.constant 0 : index
      %294 = vector.load %arg4[%c0_158, %c0_159, %c0_160] : memref<1x8x32xf32, #tpu.memory_space<vmem>>, vector<1x8x32xf32>
      %295 = vector.shape_cast %294 : vector<1x8x32xf32> to vector<8x32xf32>
      %296 = arith.truncf %295 : vector<8x32xf32> to vector<8x32xbf16>
      %cst_161 = arith.constant dense<0.000000e+00> : vector<8x32xf32>
      %297 = tpu.matmul %296, %19, %cst_161 {dimension_numbers = #tpu.dot_dimension_numbers<[1], [0], [0], [1], [0, 0, 1, 1], [], []>} : vector<8x32xbf16>, vector<32x32xbf16>, vector<8x32xf32> -> vector<8x32xf32>
      %298 = vector.broadcast %20 : vector<1x32xf32> to vector<8x32xf32>
      %299 = arith.addf %297, %298 : vector<8x32xf32>
      %300 = arith.truncf %299 : vector<8x32xf32> to vector<8x32xbf16>
      %c0_162 = arith.constant 0 : index
      %c0_163 = arith.constant 0 : index
      %301 = vector.load %arg36[%c0_162, %c0_163] : memref<8x32xbf16, #tpu.memory_space<vmem>>, vector<8x32xbf16>
      tpu.vector_store %arg36[%c0_162, %c0_163], %300 {strides = array<i32>} : memref<8x32xbf16, #tpu.memory_space<vmem>>, vector<8x32xbf16>,
      %302 = arith.truncf %295 : vector<8x32xf32> to vector<8x32xbf16>
      %cst_164 = arith.constant dense<0.000000e+00> : vector<8x32xf32>
      %303 = tpu.matmul %302, %21, %cst_164 {dimension_numbers = #tpu.dot_dimension_numbers<[1], [0], [0], [1], [0, 0, 1, 1], [], []>} : vector<8x32xbf16>, vector<32x32xbf16>, vector<8x32xf32> -> vector<8x32xf32>
      %304 = vector.broadcast %22 : vector<1x32xf32> to vector<8x32xf32>
      %305 = arith.addf %303, %304 : vector<8x32xf32>
      %306 = arith.truncf %305 : vector<8x32xf32> to vector<8x32xbf16>
      %c0_165 = arith.constant 0 : index
      %c0_166 = arith.constant 0 : index
      %307 = vector.load %arg37[%c0_165, %c0_166] : memref<8x32xbf16, #tpu.memory_space<vmem>>, vector<8x32xbf16>
      tpu.vector_store %arg37[%c0_165, %c0_166], %306 {strides = array<i32>} : memref<8x32xbf16, #tpu.memory_space<vmem>>, vector<8x32xbf16>,
      %c0_167 = arith.constant 0 : index
      %c0_168 = arith.constant 0 : index
      %c0_169 = arith.constant 0 : index
      %308 = vector.load %arg3[%c0_167, %c0_168, %c0_169] : memref<1x8x32xf32, #tpu.memory_space<vmem>>, vector<1x8x32xf32>
      %309 = vector.shape_cast %308 : vector<1x8x32xf32> to vector<8x32xf32>
      %cst_170 = arith.constant dense<0.000000e+00> : vector<8xf32>
      %310 = vector.multi_reduction <add>, %309, %cst_170 [1] : vector<8x32xf32> to vector<8xf32>
      %311 = vector.shape_cast %310 : vector<8xf32> to vector<8x1xf32>
      %cst_171 = arith.constant 3.200000e+01 : f32
      %312 = vector.broadcast %cst_171 : f32 to vector<8x1xf32>
      %313 = arith.divf %311, %312 : vector<8x1xf32>
      %314 = vector.broadcast %313 : vector<8x1xf32> to vector<8x32xf32>
      %315 = arith.subf %309, %314 : vector<8x32xf32>
      %316 = arith.mulf %315, %315 : vector<8x32xf32>
      %cst_172 = arith.constant dense<0.000000e+00> : vector<8xf32>
      %317 = vector.multi_reduction <add>, %316, %cst_172 [1] : vector<8x32xf32> to vector<8xf32>
      %318 = vector.shape_cast %317 : vector<8xf32> to vector<8x1xf32>
      %cst_173 = arith.constant 3.200000e+01 : f32
      %319 = vector.broadcast %cst_173 : f32 to vector<8x1xf32>
      %320 = arith.divf %318, %319 : vector<8x1xf32>
      %cst_174 = arith.constant 9.99999997E-7 : f32
      %321 = vector.broadcast %cst_174 : f32 to vector<8x1xf32>
      %322 = arith.addf %320, %321 : vector<8x1xf32>
      %323 = math.rsqrt %322 : vector<8x1xf32>
      %324 = vector.broadcast %323 : vector<8x1xf32> to vector<8x32xf32>
      %325 = arith.mulf %315, %324 : vector<8x32xf32>
      %326 = vector.broadcast %5 : vector<1x32xf32> to vector<8x32xf32>
      %327 = arith.mulf %325, %326 : vector<8x32xf32>
      %328 = vector.broadcast %6 : vector<1x32xf32> to vector<8x32xf32>
      %329 = arith.addf %327, %328 : vector<8x32xf32>
      %330 = arith.truncf %329 : vector<8x32xf32> to vector<8x32xbf16>
      %cst_175 = arith.constant dense<0.000000e+00> : vector<8x32xf32>
      %331 = tpu.matmul %330, %9, %cst_175 {dimension_numbers = #tpu.dot_dimension_numbers<[1], [0], [0], [1], [0, 0, 1, 1], [], []>} : vector<8x32xbf16>, vector<32x32xbf16>, vector<8x32xf32> -> vector<8x32xf32>
      %332 = vector.broadcast %10 : vector<1x32xf32> to vector<8x32xf32>
      %333 = arith.addf %331, %332 : vector<8x32xf32>
      %334 = arith.truncf %333 : vector<8x32xf32> to vector<8x32xbf16>
      %c0_176 = arith.constant 0 : index
      %c0_177 = arith.constant 0 : index
      %335 = vector.load %arg34[%c0_176, %c0_177] : memref<8x32xbf16, #tpu.memory_space<vmem>>, vector<8x32xbf16>
      tpu.vector_store %arg34[%c0_176, %c0_177], %334 {strides = array<i32>} : memref<8x32xbf16, #tpu.memory_space<vmem>>, vector<8x32xbf16>,
      %336 = arith.truncf %329 : vector<8x32xf32> to vector<8x32xbf16>
      %cst_178 = arith.constant dense<0.000000e+00> : vector<8x32xf32>
      %337 = tpu.matmul %336, %11, %cst_178 {dimension_numbers = #tpu.dot_dimension_numbers<[1], [0], [0], [1], [0, 0, 1, 1], [], []>} : vector<8x32xbf16>, vector<32x32xbf16>, vector<8x32xf32> -> vector<8x32xf32>
      %338 = vector.broadcast %12 : vector<1x32xf32> to vector<8x32xf32>
      %339 = arith.addf %337, %338 : vector<8x32xf32>
      %340 = arith.truncf %339 : vector<8x32xf32> to vector<8x32xbf16>
      %c0_179 = arith.constant 0 : index
      %c0_180 = arith.constant 0 : index
      %341 = vector.load %arg35[%c0_179, %c0_180] : memref<8x32xbf16, #tpu.memory_space<vmem>>, vector<8x32xbf16>
      tpu.vector_store %arg35[%c0_179, %c0_180], %340 {strides = array<i32>} : memref<8x32xbf16, #tpu.memory_space<vmem>>, vector<8x32xbf16>,
    } else {
    }
    %cst = arith.constant dense<0.000000e+00> : vector<8xf32>
    %34 = vector.multi_reduction <add>, %1, %cst [1] : vector<8x32xf32> to vector<8xf32>
    %35 = vector.shape_cast %34 : vector<8xf32> to vector<8x1xf32>
    %cst_58 = arith.constant 3.200000e+01 : f32
    %36 = vector.broadcast %cst_58 : f32 to vector<8x1xf32>
    %37 = arith.divf %35, %36 : vector<8x1xf32>
    %38 = vector.broadcast %37 : vector<8x1xf32> to vector<8x32xf32>
    %39 = arith.subf %1, %38 : vector<8x32xf32>
    %40 = arith.mulf %39, %39 : vector<8x32xf32>
    %cst_59 = arith.constant dense<0.000000e+00> : vector<8xf32>
    %41 = vector.multi_reduction <add>, %40, %cst_59 [1] : vector<8x32xf32> to vector<8xf32>
    %42 = vector.shape_cast %41 : vector<8xf32> to vector<8x1xf32>
    %cst_60 = arith.constant 3.200000e+01 : f32
    %43 = vector.broadcast %cst_60 : f32 to vector<8x1xf32>
    %44 = arith.divf %42, %43 : vector<8x1xf32>
    %cst_61 = arith.constant 9.99999997E-7 : f32
    %45 = vector.broadcast %cst_61 : f32 to vector<8x1xf32>
    %46 = arith.addf %44, %45 : vector<8x1xf32>
    %47 = math.rsqrt %46 : vector<8x1xf32>
    %48 = vector.broadcast %47 : vector<8x1xf32> to vector<8x32xf32>
    %49 = arith.mulf %39, %48 : vector<8x32xf32>
    %50 = vector.broadcast %5 : vector<1x32xf32> to vector<8x32xf32>
    %51 = arith.mulf %49, %50 : vector<8x32xf32>
    %52 = vector.broadcast %6 : vector<1x32xf32> to vector<8x32xf32>
    %53 = arith.addf %51, %52 : vector<8x32xf32>
    %c8_i32 = arith.constant 8 : i32
    %54 = arith.muli %arg1, %c8_i32 : i32
    %55 = tpu.iota {dimensions = array<i32: 0>} : vector<8x8xi32>
    %56 = vector.broadcast %54 : i32 to vector<8x8xi32>
    %57 = arith.addi %56, %55 : vector<8x8xi32>
    %58 = tpu.iota {dimensions = array<i32: 1>} : vector<8x8xi32>
    %59 = arith.cmpi sle, %58, %57 : vector<8x8xi32>
    %cst_62 = arith.constant 0.000000e+00 : f32
    %cst_63 = arith.constant 0xFF800000 : f32
    %60 = vector.broadcast %cst_62 : f32 to vector<8x8xf32>
    %61 = vector.broadcast %cst_63 : f32 to vector<8x8xf32>
    %62 = arith.select %59, %60, %61 : vector<8x8xi1>, vector<8x8xf32>
    %63 = arith.truncf %53 : vector<8x32xf32> to vector<8x32xbf16>
    %cst_64 = arith.constant dense<0.000000e+00> : vector<8x32xf32>
    %64 = tpu.matmul %63, %7, %cst_64 {dimension_numbers = #tpu.dot_dimension_numbers<[1], [0], [0], [1], [0, 0, 1, 1], [], []>} : vector<8x32xbf16>, vector<32x32xbf16>, vector<8x32xf32> -> vector<8x32xf32>
    %65 = vector.broadcast %8 : vector<1x32xf32> to vector<8x32xf32>
    %66 = arith.addf %64, %65 : vector<8x32xf32>
    %cst_65 = arith.constant 0.353553385 : f32
    %67 = vector.broadcast %cst_65 : f32 to vector<8x32xf32>
    %68 = arith.mulf %66, %67 : vector<8x32xf32>
    %69 = arith.truncf %68 : vector<8x32xf32> to vector<8x32xbf16>
    %70 = vector.extract_strided_slice %69 {offsets = [0, 0], sizes = [8, 8], strides = [1, 1]} : vector<8x32xbf16> to vector<8x8xbf16>
    %c0_66 = arith.constant 0 : index
    %c0_67 = arith.constant 0 : index
    %71 = vector.load %arg34[%c0_66, %c0_67] : memref<8x32xbf16, #tpu.memory_space<vmem>>, vector<8x8xbf16>
    %cst_68 = arith.constant dense<0.000000e+00> : vector<8x8xf32>
    %72 = tpu.matmul %70, %71, %cst_68 {dimension_numbers = #tpu.dot_dimension_numbers<[1], [1], [0], [0], [0, 0, 1, 0], [], []>} : vector<8x8xbf16>, vector<8x8xbf16>, vector<8x8xf32> -> vector<8x8xf32>
    %73 = arith.addf %72, %62 : vector<8x8xf32>
    %cst_69 = arith.constant dense<0xFF800000> : vector<8xf32>
    %74 = vector.multi_reduction <maximumf>, %73, %cst_69 [1] : vector<8x8xf32> to vector<8xf32>
    %75 = vector.shape_cast %74 : vector<8xf32> to vector<8x1xf32>
    %76 = vector.broadcast %75 : vector<8x1xf32> to vector<8x8xf32>
    %77 = arith.subf %73, %76 : vector<8x8xf32>
    %78 = math.exp %77 : vector<8x8xf32>
    %cst_70 = arith.constant dense<0.000000e+00> : vector<8xf32>
    %79 = vector.multi_reduction <add>, %78, %cst_70 [1] : vector<8x8xf32> to vector<8xf32>
    %80 = vector.shape_cast %79 : vector<8xf32> to vector<8x1xf32>
    %81 = arith.truncf %78 : vector<8x8xf32> to vector<8x8xbf16>
    %c0_71 = arith.constant 0 : index
    %c0_72 = arith.constant 0 : index
    %82 = vector.load %arg35[%c0_71, %c0_72] : memref<8x32xbf16, #tpu.memory_space<vmem>>, vector<8x8xbf16>
    %cst_73 = arith.constant dense<0.000000e+00> : vector<8x8xf32>
    %83 = tpu.matmul %81, %82, %cst_73 {dimension_numbers = #tpu.dot_dimension_numbers<[1], [0], [0], [1], [0, 0, 1, 1], [], []>} : vector<8x8xbf16>, vector<8x8xbf16>, vector<8x8xf32> -> vector<8x8xf32>
    %cst_74 = arith.constant 1.000000e+00 : f32
    %84 = vector.broadcast %cst_74 : f32 to vector<8x1xf32>
    %85 = arith.divf %84, %80 : vector<8x1xf32>
    %86 = vector.broadcast %85 : vector<8x1xf32> to vector<8x8xf32>
    %87 = arith.mulf %83, %86 : vector<8x8xf32>
    %88 = vector.extract_strided_slice %69 {offsets = [0, 8], sizes = [8, 8], strides = [1, 1]} : vector<8x32xbf16> to vector<8x8xbf16>
    %c0_75 = arith.constant 0 : index
    %c8 = arith.constant 8 : index
    %89 = vector.load %arg34[%c0_75, %c8] : memref<8x32xbf16, #tpu.memory_space<vmem>>, vector<8x8xbf16>
    %cst_76 = arith.constant dense<0.000000e+00> : vector<8x8xf32>
    %90 = tpu.matmul %88, %89, %cst_76 {dimension_numbers = #tpu.dot_dimension_numbers<[1], [1], [0], [0], [0, 0, 1, 0], [], []>} : vector<8x8xbf16>, vector<8x8xbf16>, vector<8x8xf32> -> vector<8x8xf32>
    %91 = arith.addf %90, %62 : vector<8x8xf32>
    %cst_77 = arith.constant dense<0xFF800000> : vector<8xf32>
    %92 = vector.multi_reduction <maximumf>, %91, %cst_77 [1] : vector<8x8xf32> to vector<8xf32>
    %93 = vector.shape_cast %92 : vector<8xf32> to vector<8x1xf32>
    %94 = vector.broadcast %93 : vector<8x1xf32> to vector<8x8xf32>
    %95 = arith.subf %91, %94 : vector<8x8xf32>
    %96 = math.exp %95 : vector<8x8xf32>
    %cst_78 = arith.constant dense<0.000000e+00> : vector<8xf32>
    %97 = vector.multi_reduction <add>, %96, %cst_78 [1] : vector<8x8xf32> to vector<8xf32>
    %98 = vector.shape_cast %97 : vector<8xf32> to vector<8x1xf32>
    %99 = arith.truncf %96 : vector<8x8xf32> to vector<8x8xbf16>
    %c0_79 = arith.constant 0 : index
    %c8_80 = arith.constant 8 : index
    %100 = vector.load %arg35[%c0_79, %c8_80] : memref<8x32xbf16, #tpu.memory_space<vmem>>, vector<8x8xbf16>
    %cst_81 = arith.constant dense<0.000000e+00> : vector<8x8xf32>
    %101 = tpu.matmul %99, %100, %cst_81 {dimension_numbers = #tpu.dot_dimension_numbers<[1], [0], [0], [1], [0, 0, 1, 1], [], []>} : vector<8x8xbf16>, vector<8x8xbf16>, vector<8x8xf32> -> vector<8x8xf32>
    %cst_82 = arith.constant 1.000000e+00 : f32
    %102 = vector.broadcast %cst_82 : f32 to vector<8x1xf32>
    %103 = arith.divf %102, %98 : vector<8x1xf32>
    %104 = vector.broadcast %103 : vector<8x1xf32> to vector<8x8xf32>
    %105 = arith.mulf %101, %104 : vector<8x8xf32>
    %106 = vector.extract_strided_slice %69 {offsets = [0, 16], sizes = [8, 8], strides = [1, 1]} : vector<8x32xbf16> to vector<8x8xbf16>
    %c0_83 = arith.constant 0 : index
    %c16 = arith.constant 16 : index
    %107 = vector.load %arg34[%c0_83, %c16] : memref<8x32xbf16, #tpu.memory_space<vmem>>, vector<8x8xbf16>
    %cst_84 = arith.constant dense<0.000000e+00> : vector<8x8xf32>
    %108 = tpu.matmul %106, %107, %cst_84 {dimension_numbers = #tpu.dot_dimension_numbers<[1], [1], [0], [0], [0, 0, 1, 0], [], []>} : vector<8x8xbf16>, vector<8x8xbf16>, vector<8x8xf32> -> vector<8x8xf32>
    %109 = arith.addf %108, %62 : vector<8x8xf32>
    %cst_85 = arith.constant dense<0xFF800000> : vector<8xf32>
    %110 = vector.multi_reduction <maximumf>, %109, %cst_85 [1] : vector<8x8xf32> to vector<8xf32>
    %111 = vector.shape_cast %110 : vector<8xf32> to vector<8x1xf32>
    %112 = vector.broadcast %111 : vector<8x1xf32> to vector<8x8xf32>
    %113 = arith.subf %109, %112 : vector<8x8xf32>
    %114 = math.exp %113 : vector<8x8xf32>
    %cst_86 = arith.constant dense<0.000000e+00> : vector<8xf32>
    %115 = vector.multi_reduction <add>, %114, %cst_86 [1] : vector<8x8xf32> to vector<8xf32>
    %116 = vector.shape_cast %115 : vector<8xf32> to vector<8x1xf32>
    %117 = arith.truncf %114 : vector<8x8xf32> to vector<8x8xbf16>
    %c0_87 = arith.constant 0 : index
    %c16_88 = arith.constant 16 : index
    %118 = vector.load %arg35[%c0_87, %c16_88] : memref<8x32xbf16, #tpu.memory_space<vmem>>, vector<8x8xbf16>
    %cst_89 = arith.constant dense<0.000000e+00> : vector<8x8xf32>
    %119 = tpu.matmul %117, %118, %cst_89 {dimension_numbers = #tpu.dot_dimension_numbers<[1], [0], [0], [1], [0, 0, 1, 1], [], []>} : vector<8x8xbf16>, vector<8x8xbf16>, vector<8x8xf32> -> vector<8x8xf32>
    %cst_90 = arith.constant 1.000000e+00 : f32
    %120 = vector.broadcast %cst_90 : f32 to vector<8x1xf32>
    %121 = arith.divf %120, %116 : vector<8x1xf32>
    %122 = vector.broadcast %121 : vector<8x1xf32> to vector<8x8xf32>
    %123 = arith.mulf %119, %122 : vector<8x8xf32>
    %124 = vector.extract_strided_slice %69 {offsets = [0, 24], sizes = [8, 8], strides = [1, 1]} : vector<8x32xbf16> to vector<8x8xbf16>
    %c0_91 = arith.constant 0 : index
    %c24 = arith.constant 24 : index
    %125 = vector.load %arg34[%c0_91, %c24] : memref<8x32xbf16, #tpu.memory_space<vmem>>, vector<8x8xbf16>
    %cst_92 = arith.constant dense<0.000000e+00> : vector<8x8xf32>
    %126 = tpu.matmul %124, %125, %cst_92 {dimension_numbers = #tpu.dot_dimension_numbers<[1], [1], [0], [0], [0, 0, 1, 0], [], []>} : vector<8x8xbf16>, vector<8x8xbf16>, vector<8x8xf32> -> vector<8x8xf32>
    %127 = arith.addf %126, %62 : vector<8x8xf32>
    %cst_93 = arith.constant dense<0xFF800000> : vector<8xf32>
    %128 = vector.multi_reduction <maximumf>, %127, %cst_93 [1] : vector<8x8xf32> to vector<8xf32>
    %129 = vector.shape_cast %128 : vector<8xf32> to vector<8x1xf32>
    %130 = vector.broadcast %129 : vector<8x1xf32> to vector<8x8xf32>
    %131 = arith.subf %127, %130 : vector<8x8xf32>
    %132 = math.exp %131 : vector<8x8xf32>
    %cst_94 = arith.constant dense<0.000000e+00> : vector<8xf32>
    %133 = vector.multi_reduction <add>, %132, %cst_94 [1] : vector<8x8xf32> to vector<8xf32>
    %134 = vector.shape_cast %133 : vector<8xf32> to vector<8x1xf32>
    %135 = arith.truncf %132 : vector<8x8xf32> to vector<8x8xbf16>
    %c0_95 = arith.constant 0 : index
    %c24_96 = arith.constant 24 : index
    %136 = vector.load %arg35[%c0_95, %c24_96] : memref<8x32xbf16, #tpu.memory_space<vmem>>, vector<8x8xbf16>
    %cst_97 = arith.constant dense<0.000000e+00> : vector<8x8xf32>
    %137 = tpu.matmul %135, %136, %cst_97 {dimension_numbers = #tpu.dot_dimension_numbers<[1], [0], [0], [1], [0, 0, 1, 1], [], []>} : vector<8x8xbf16>, vector<8x8xbf16>, vector<8x8xf32> -> vector<8x8xf32>
    %cst_98 = arith.constant 1.000000e+00 : f32
    %138 = vector.broadcast %cst_98 : f32 to vector<8x1xf32>
    %139 = arith.divf %138, %134 : vector<8x1xf32>
    %140 = vector.broadcast %139 : vector<8x1xf32> to vector<8x8xf32>
    %141 = arith.mulf %137, %140 : vector<8x8xf32>
    %142 = tpu.concatenate %87, %105, %123, %141 in 1 : vector<8x8xf32>, vector<8x8xf32>, vector<8x8xf32>, vector<8x8xf32> -> vector<8x32xf32>
    %143 = arith.truncf %142 : vector<8x32xf32> to vector<8x32xbf16>
    %cst_99 = arith.constant dense<0.000000e+00> : vector<8x32xf32>
    %144 = tpu.matmul %143, %13, %cst_99 {dimension_numbers = #tpu.dot_dimension_numbers<[1], [0], [0], [1], [0, 0, 1, 1], [], []>} : vector<8x32xbf16>, vector<32x32xbf16>, vector<8x32xf32> -> vector<8x32xf32>
    %145 = vector.broadcast %14 : vector<1x32xf32> to vector<8x32xf32>
    %146 = arith.addf %144, %145 : vector<8x32xf32>
    %147 = arith.addf %146, %1 : vector<8x32xf32>
    %cst_100 = arith.constant dense<0.000000e+00> : vector<8xf32>
    %148 = vector.multi_reduction <add>, %147, %cst_100 [1] : vector<8x32xf32> to vector<8xf32>
    %149 = vector.shape_cast %148 : vector<8xf32> to vector<8x1xf32>
    %cst_101 = arith.constant 3.200000e+01 : f32
    %150 = vector.broadcast %cst_101 : f32 to vector<8x1xf32>
    %151 = arith.divf %149, %150 : vector<8x1xf32>
    %152 = vector.broadcast %151 : vector<8x1xf32> to vector<8x32xf32>
    %153 = arith.subf %147, %152 : vector<8x32xf32>
    %154 = arith.mulf %153, %153 : vector<8x32xf32>
    %cst_102 = arith.constant dense<0.000000e+00> : vector<8xf32>
    %155 = vector.multi_reduction <add>, %154, %cst_102 [1] : vector<8x32xf32> to vector<8xf32>
    %156 = vector.shape_cast %155 : vector<8xf32> to vector<8x1xf32>
    %cst_103 = arith.constant 3.200000e+01 : f32
    %157 = vector.broadcast %cst_103 : f32 to vector<8x1xf32>
    %158 = arith.divf %156, %157 : vector<8x1xf32>
    %cst_104 = arith.constant 9.99999997E-7 : f32
    %159 = vector.broadcast %cst_104 : f32 to vector<8x1xf32>
    %160 = arith.addf %158, %159 : vector<8x1xf32>
    %161 = math.rsqrt %160 : vector<8x1xf32>
    %162 = vector.broadcast %161 : vector<8x1xf32> to vector<8x32xf32>
    %163 = arith.mulf %153, %162 : vector<8x32xf32>
    %164 = vector.broadcast %15 : vector<1x32xf32> to vector<8x32xf32>
    %165 = arith.mulf %163, %164 : vector<8x32xf32>
    %166 = vector.broadcast %16 : vector<1x32xf32> to vector<8x32xf32>
    %167 = arith.addf %165, %166 : vector<8x32xf32>
    %168 = arith.truncf %167 : vector<8x32xf32> to vector<8x32xbf16>
    %cst_105 = arith.constant dense<0.000000e+00> : vector<8x32xf32>
    %169 = tpu.matmul %168, %17, %cst_105 {dimension_numbers = #tpu.dot_dimension_numbers<[1], [0], [0], [1], [0, 0, 1, 1], [], []>} : vector<8x32xbf16>, vector<32x32xbf16>, vector<8x32xf32> -> vector<8x32xf32>
    %170 = vector.broadcast %18 : vector<1x32xf32> to vector<8x32xf32>
    %171 = arith.addf %169, %170 : vector<8x32xf32>
    %cst_106 = arith.constant 0.353553385 : f32
    %172 = vector.broadcast %cst_106 : f32 to vector<8x32xf32>
    %173 = arith.mulf %171, %172 : vector<8x32xf32>
    %174 = arith.truncf %173 : vector<8x32xf32> to vector<8x32xbf16>
    %175 = vector.extract_strided_slice %174 {offsets = [0, 0], sizes = [8, 8], strides = [1, 1]} : vector<8x32xbf16> to vector<8x8xbf16>
    %c0_107 = arith.constant 0 : index
    %c0_108 = arith.constant 0 : index
    %176 = vector.load %arg36[%c0_107, %c0_108] : memref<8x32xbf16, #tpu.memory_space<vmem>>, vector<8x8xbf16>
    %cst_109 = arith.constant dense<0.000000e+00> : vector<8x8xf32>
    %177 = tpu.matmul %175, %176, %cst_109 {dimension_numbers = #tpu.dot_dimension_numbers<[1], [1], [0], [0], [0, 0, 1, 0], [], []>} : vector<8x8xbf16>, vector<8x8xbf16>, vector<8x8xf32> -> vector<8x8xf32>
    %178 = vector.broadcast %4 : vector<1x8xf32> to vector<8x8xf32>
    %179 = arith.addf %177, %178 : vector<8x8xf32>
    %cst_110 = arith.constant dense<0xFF800000> : vector<8xf32>
    %180 = vector.multi_reduction <maximumf>, %179, %cst_110 [1] : vector<8x8xf32> to vector<8xf32>
    %181 = vector.shape_cast %180 : vector<8xf32> to vector<8x1xf32>
    %182 = vector.broadcast %181 : vector<8x1xf32> to vector<8x8xf32>
    %183 = arith.subf %179, %182 : vector<8x8xf32>
    %184 = math.exp %183 : vector<8x8xf32>
    %cst_111 = arith.constant dense<0.000000e+00> : vector<8xf32>
    %185 = vector.multi_reduction <add>, %184, %cst_111 [1] : vector<8x8xf32> to vector<8xf32>
    %186 = vector.shape_cast %185 : vector<8xf32> to vector<8x1xf32>
    %187 = arith.truncf %184 : vector<8x8xf32> to vector<8x8xbf16>
    %c0_112 = arith.constant 0 : index
    %c0_113 = arith.constant 0 : index
    %188 = vector.load %arg37[%c0_112, %c0_113] : memref<8x32xbf16, #tpu.memory_space<vmem>>, vector<8x8xbf16>
    %cst_114 = arith.constant dense<0.000000e+00> : vector<8x8xf32>
    %189 = tpu.matmul %187, %188, %cst_114 {dimension_numbers = #tpu.dot_dimension_numbers<[1], [0], [0], [1], [0, 0, 1, 1], [], []>} : vector<8x8xbf16>, vector<8x8xbf16>, vector<8x8xf32> -> vector<8x8xf32>
    %cst_115 = arith.constant 1.000000e+00 : f32
    %190 = vector.broadcast %cst_115 : f32 to vector<8x1xf32>
    %191 = arith.divf %190, %186 : vector<8x1xf32>
    %192 = vector.broadcast %191 : vector<8x1xf32> to vector<8x8xf32>
    %193 = arith.mulf %189, %192 : vector<8x8xf32>
    %194 = vector.extract_strided_slice %174 {offsets = [0, 8], sizes = [8, 8], strides = [1, 1]} : vector<8x32xbf16> to vector<8x8xbf16>
    %c0_116 = arith.constant 0 : index
    %c8_117 = arith.constant 8 : index
    %195 = vector.load %arg36[%c0_116, %c8_117] : memref<8x32xbf16, #tpu.memory_space<vmem>>, vector<8x8xbf16>
    %cst_118 = arith.constant dense<0.000000e+00> : vector<8x8xf32>
    %196 = tpu.matmul %194, %195, %cst_118 {dimension_numbers = #tpu.dot_dimension_numbers<[1], [1], [0], [0], [0, 0, 1, 0], [], []>} : vector<8x8xbf16>, vector<8x8xbf16>, vector<8x8xf32> -> vector<8x8xf32>
    %197 = vector.broadcast %4 : vector<1x8xf32> to vector<8x8xf32>
    %198 = arith.addf %196, %197 : vector<8x8xf32>
    %cst_119 = arith.constant dense<0xFF800000> : vector<8xf32>
    %199 = vector.multi_reduction <maximumf>, %198, %cst_119 [1] : vector<8x8xf32> to vector<8xf32>
    %200 = vector.shape_cast %199 : vector<8xf32> to vector<8x1xf32>
    %201 = vector.broadcast %200 : vector<8x1xf32> to vector<8x8xf32>
    %202 = arith.subf %198, %201 : vector<8x8xf32>
    %203 = math.exp %202 : vector<8x8xf32>
    %cst_120 = arith.constant dense<0.000000e+00> : vector<8xf32>
    %204 = vector.multi_reduction <add>, %203, %cst_120 [1] : vector<8x8xf32> to vector<8xf32>
    %205 = vector.shape_cast %204 : vector<8xf32> to vector<8x1xf32>
    %206 = arith.truncf %203 : vector<8x8xf32> to vector<8x8xbf16>
    %c0_121 = arith.constant 0 : index
    %c8_122 = arith.constant 8 : index
    %207 = vector.load %arg37[%c0_121, %c8_122] : memref<8x32xbf16, #tpu.memory_space<vmem>>, vector<8x8xbf16>
    %cst_123 = arith.constant dense<0.000000e+00> : vector<8x8xf32>
    %208 = tpu.matmul %206, %207, %cst_123 {dimension_numbers = #tpu.dot_dimension_numbers<[1], [0], [0], [1], [0, 0, 1, 1], [], []>} : vector<8x8xbf16>, vector<8x8xbf16>, vector<8x8xf32> -> vector<8x8xf32>
    %cst_124 = arith.constant 1.000000e+00 : f32
    %209 = vector.broadcast %cst_124 : f32 to vector<8x1xf32>
    %210 = arith.divf %209, %205 : vector<8x1xf32>
    %211 = vector.broadcast %210 : vector<8x1xf32> to vector<8x8xf32>
    %212 = arith.mulf %208, %211 : vector<8x8xf32>
    %213 = vector.extract_strided_slice %174 {offsets = [0, 16], sizes = [8, 8], strides = [1, 1]} : vector<8x32xbf16> to vector<8x8xbf16>
    %c0_125 = arith.constant 0 : index
    %c16_126 = arith.constant 16 : index
    %214 = vector.load %arg36[%c0_125, %c16_126] : memref<8x32xbf16, #tpu.memory_space<vmem>>, vector<8x8xbf16>
    %cst_127 = arith.constant dense<0.000000e+00> : vector<8x8xf32>
    %215 = tpu.matmul %213, %214, %cst_127 {dimension_numbers = #tpu.dot_dimension_numbers<[1], [1], [0], [0], [0, 0, 1, 0], [], []>} : vector<8x8xbf16>, vector<8x8xbf16>, vector<8x8xf32> -> vector<8x8xf32>
    %216 = vector.broadcast %4 : vector<1x8xf32> to vector<8x8xf32>
    %217 = arith.addf %215, %216 : vector<8x8xf32>
    %cst_128 = arith.constant dense<0xFF800000> : vector<8xf32>
    %218 = vector.multi_reduction <maximumf>, %217, %cst_128 [1] : vector<8x8xf32> to vector<8xf32>
    %219 = vector.shape_cast %218 : vector<8xf32> to vector<8x1xf32>
    %220 = vector.broadcast %219 : vector<8x1xf32> to vector<8x8xf32>
    %221 = arith.subf %217, %220 : vector<8x8xf32>
    %222 = math.exp %221 : vector<8x8xf32>
    %cst_129 = arith.constant dense<0.000000e+00> : vector<8xf32>
    %223 = vector.multi_reduction <add>, %222, %cst_129 [1] : vector<8x8xf32> to vector<8xf32>
    %224 = vector.shape_cast %223 : vector<8xf32> to vector<8x1xf32>
    %225 = arith.truncf %222 : vector<8x8xf32> to vector<8x8xbf16>
    %c0_130 = arith.constant 0 : index
    %c16_131 = arith.constant 16 : index
    %226 = vector.load %arg37[%c0_130, %c16_131] : memref<8x32xbf16, #tpu.memory_space<vmem>>, vector<8x8xbf16>
    %cst_132 = arith.constant dense<0.000000e+00> : vector<8x8xf32>
    %227 = tpu.matmul %225, %226, %cst_132 {dimension_numbers = #tpu.dot_dimension_numbers<[1], [0], [0], [1], [0, 0, 1, 1], [], []>} : vector<8x8xbf16>, vector<8x8xbf16>, vector<8x8xf32> -> vector<8x8xf32>
    %cst_133 = arith.constant 1.000000e+00 : f32
    %228 = vector.broadcast %cst_133 : f32 to vector<8x1xf32>
    %229 = arith.divf %228, %224 : vector<8x1xf32>
    %230 = vector.broadcast %229 : vector<8x1xf32> to vector<8x8xf32>
    %231 = arith.mulf %227, %230 : vector<8x8xf32>
    %232 = vector.extract_strided_slice %174 {offsets = [0, 24], sizes = [8, 8], strides = [1, 1]} : vector<8x32xbf16> to vector<8x8xbf16>
    %c0_134 = arith.constant 0 : index
    %c24_135 = arith.constant 24 : index
    %233 = vector.load %arg36[%c0_134, %c24_135] : memref<8x32xbf16, #tpu.memory_space<vmem>>, vector<8x8xbf16>
    %cst_136 = arith.constant dense<0.000000e+00> : vector<8x8xf32>
    %234 = tpu.matmul %232, %233, %cst_136 {dimension_numbers = #tpu.dot_dimension_numbers<[1], [1], [0], [0], [0, 0, 1, 0], [], []>} : vector<8x8xbf16>, vector<8x8xbf16>, vector<8x8xf32> -> vector<8x8xf32>
    %235 = vector.broadcast %4 : vector<1x8xf32> to vector<8x8xf32>
    %236 = arith.addf %234, %235 : vector<8x8xf32>
    %cst_137 = arith.constant dense<0xFF800000> : vector<8xf32>
    %237 = vector.multi_reduction <maximumf>, %236, %cst_137 [1] : vector<8x8xf32> to vector<8xf32>
    %238 = vector.shape_cast %237 : vector<8xf32> to vector<8x1xf32>
    %239 = vector.broadcast %238 : vector<8x1xf32> to vector<8x8xf32>
    %240 = arith.subf %236, %239 : vector<8x8xf32>
    %241 = math.exp %240 : vector<8x8xf32>
    %cst_138 = arith.constant dense<0.000000e+00> : vector<8xf32>
    %242 = vector.multi_reduction <add>, %241, %cst_138 [1] : vector<8x8xf32> to vector<8xf32>
    %243 = vector.shape_cast %242 : vector<8xf32> to vector<8x1xf32>
    %244 = arith.truncf %241 : vector<8x8xf32> to vector<8x8xbf16>
    %c0_139 = arith.constant 0 : index
    %c24_140 = arith.constant 24 : index
    %245 = vector.load %arg37[%c0_139, %c24_140] : memref<8x32xbf16, #tpu.memory_space<vmem>>, vector<8x8xbf16>
    %cst_141 = arith.constant dense<0.000000e+00> : vector<8x8xf32>
    %246 = tpu.matmul %244, %245, %cst_141 {dimension_numbers = #tpu.dot_dimension_numbers<[1], [0], [0], [1], [0, 0, 1, 1], [], []>} : vector<8x8xbf16>, vector<8x8xbf16>, vector<8x8xf32> -> vector<8x8xf32>
    %cst_142 = arith.constant 1.000000e+00 : f32
    %247 = vector.broadcast %cst_142 : f32 to vector<8x1xf32>
    %248 = arith.divf %247, %243 : vector<8x1xf32>
    %249 = vector.broadcast %248 : vector<8x1xf32> to vector<8x8xf32>
    %250 = arith.mulf %246, %249 : vector<8x8xf32>
    %251 = tpu.concatenate %193, %212, %231, %250 in 1 : vector<8x8xf32>, vector<8x8xf32>, vector<8x8xf32>, vector<8x8xf32> -> vector<8x32xf32>
    %252 = arith.truncf %251 : vector<8x32xf32> to vector<8x32xbf16>
    %cst_143 = arith.constant dense<0.000000e+00> : vector<8x32xf32>
    %253 = tpu.matmul %252, %23, %cst_143 {dimension_numbers = #tpu.dot_dimension_numbers<[1], [0], [0], [1], [0, 0, 1, 1], [], []>} : vector<8x32xbf16>, vector<32x32xbf16>, vector<8x32xf32> -> vector<8x32xf32>
    %254 = vector.broadcast %24 : vector<1x32xf32> to vector<8x32xf32>
    %255 = arith.addf %253, %254 : vector<8x32xf32>
    %256 = arith.addf %255, %147 : vector<8x32xf32>
    %cst_144 = arith.constant dense<0.000000e+00> : vector<8xf32>
    %257 = vector.multi_reduction <add>, %256, %cst_144 [1] : vector<8x32xf32> to vector<8xf32>
    %258 = vector.shape_cast %257 : vector<8xf32> to vector<8x1xf32>
    %cst_145 = arith.constant 3.200000e+01 : f32
    %259 = vector.broadcast %cst_145 : f32 to vector<8x1xf32>
    %260 = arith.divf %258, %259 : vector<8x1xf32>
    %261 = vector.broadcast %260 : vector<8x1xf32> to vector<8x32xf32>
    %262 = arith.subf %256, %261 : vector<8x32xf32>
    %263 = arith.mulf %262, %262 : vector<8x32xf32>
    %cst_146 = arith.constant dense<0.000000e+00> : vector<8xf32>
    %264 = vector.multi_reduction <add>, %263, %cst_146 [1] : vector<8x32xf32> to vector<8xf32>
    %265 = vector.shape_cast %264 : vector<8xf32> to vector<8x1xf32>
    %cst_147 = arith.constant 3.200000e+01 : f32
    %266 = vector.broadcast %cst_147 : f32 to vector<8x1xf32>
    %267 = arith.divf %265, %266 : vector<8x1xf32>
    %cst_148 = arith.constant 9.99999997E-7 : f32
    %268 = vector.broadcast %cst_148 : f32 to vector<8x1xf32>
    %269 = arith.addf %267, %268 : vector<8x1xf32>
    %270 = math.rsqrt %269 : vector<8x1xf32>
    %271 = vector.broadcast %270 : vector<8x1xf32> to vector<8x32xf32>
    %272 = arith.mulf %262, %271 : vector<8x32xf32>
    %273 = vector.broadcast %25 : vector<1x32xf32> to vector<8x32xf32>
    %274 = arith.mulf %272, %273 : vector<8x32xf32>
    %275 = vector.broadcast %26 : vector<1x32xf32> to vector<8x32xf32>
    %276 = arith.addf %274, %275 : vector<8x32xf32>
    %277 = arith.truncf %276 : vector<8x32xf32> to vector<8x32xbf16>
    %cst_149 = arith.constant dense<0.000000e+00> : vector<8x64xf32>
    %278 = tpu.matmul %277, %27, %cst_149 {dimension_numbers = #tpu.dot_dimension_numbers<[1], [0], [0], [1], [0, 0, 1, 1], [], []>} : vector<8x32xbf16>, vector<32x64xbf16>, vector<8x64xf32> -> vector<8x64xf32>
    %279 = vector.broadcast %28 : vector<1x64xf32> to vector<8x64xf32>
    %280 = arith.addf %278, %279 : vector<8x64xf32>
    %cst_150 = arith.constant 0.000000e+00 : f32
    %281 = vector.broadcast %cst_150 : f32 to vector<8x64xf32>
    %282 = arith.maximumf %280, %281 : vector<8x64xf32>
    %283 = arith.truncf %282 : vector<8x64xf32> to vector<8x64xbf16>
    %cst_151 = arith.constant dense<0.000000e+00> : vector<8x32xf32>
    %284 = tpu.matmul %283, %29, %cst_151 {dimension_numbers = #tpu.dot_dimension_numbers<[1], [0], [0], [1], [0, 0, 1, 1], [], []>} : vector<8x64xbf16>, vector<64x32xbf16>, vector<8x32xf32> -> vector<8x32xf32>
    %285 = vector.broadcast %30 : vector<1x32xf32> to vector<8x32xf32>
    %286 = arith.addf %284, %285 : vector<8x32xf32>
    %287 = arith.addf %286, %256 : vector<8x32xf32>
    %c0_152 = arith.constant 0 : index
    %c0_153 = arith.constant 0 : index
    %c0_154 = arith.constant 0 : index
    %288 = vector.load %arg32[%c0_152, %c0_153, %c0_154] : memref<1x8x32xf32, #tpu.memory_space<vmem>>, vector<1x8x32xf32>
    %289 = vector.shape_cast %288 : vector<1x8x32xf32> to vector<8x32xf32>
    %290 = vector.shape_cast %287 : vector<8x32xf32> to vector<1x8x32xf32>
    tpu.vector_store %arg32[%c0_152, %c0_153, %c0_154], %290 {strides = array<i32>} : memref<1x8x32xf32, #tpu.memory_space<vmem>>, vector<1x8x32xf32>,
    %c0_155 = arith.constant 0 : index
    %c0_156 = arith.constant 0 : index
    %c0_157 = arith.constant 0 : index
    %291 = vector.load %arg33[%c0_155, %c0_156, %c0_157] : memref<1x8x32xf32, #tpu.memory_space<vmem>>, vector<1x8x32xf32>
    %292 = vector.shape_cast %291 : vector<1x8x32xf32> to vector<8x32xf32>
    %293 = vector.shape_cast %255 : vector<8x32xf32> to vector<1x8x32xf32>
    tpu.vector_store %arg33[%c0_155, %c0_156, %c0_157], %293 {strides = array<i32>} : memref<1x8x32xf32, #tpu.memory_space<vmem>>, vector<1x8x32xf32>,
    return
  }
  func.func @transform_0(%arg0: i32, %arg1: i32) -> (i32, i32, i32) {
    %c0_i32 = arith.constant 0 : i32
    %c0_i32_0 = arith.constant 0 : i32
    return %arg0, %arg1, %c0_i32 : i32, i32, i32
  }
  func.func @transform_1(%arg0: i32, %arg1: i32) -> (i32, i32, i32) {
    %c0_i32 = arith.constant 0 : i32
    %c0_i32_0 = arith.constant 0 : i32
    %c0_i32_1 = arith.constant 0 : i32
    return %arg0, %c0_i32, %c0_i32_0 : i32, i32, i32
  }
  func.func @transform_2(%arg0: i32, %arg1: i32) -> (i32, i32, i32) {
    %c0_i32 = arith.constant 0 : i32
    %c0_i32_0 = arith.constant 0 : i32
    %c0_i32_1 = arith.constant 0 : i32
    return %arg0, %c0_i32, %c0_i32_0 : i32, i32, i32
  }
  func.func @transform_3(%arg0: i32, %arg1: i32) -> (i32, i32, i32) {
    %c0_i32 = arith.constant 0 : i32
    %c0_i32_0 = arith.constant 0 : i32
    %c0_i32_1 = arith.constant 0 : i32
    return %arg0, %c0_i32, %c0_i32_0 : i32, i32, i32
  }
  func.func @transform_4(%arg0: i32, %arg1: i32) -> (i32, i32) {
    %c0_i32 = arith.constant 0 : i32
    %c0_i32_0 = arith.constant 0 : i32
    %c0_i32_1 = arith.constant 0 : i32
    return %c0_i32, %c0_i32_0 : i32, i32
  }
  func.func @transform_5(%arg0: i32, %arg1: i32) -> (i32, i32) {
    %c0_i32 = arith.constant 0 : i32
    %c0_i32_0 = arith.constant 0 : i32
    %c0_i32_1 = arith.constant 0 : i32
    return %c0_i32, %c0_i32_0 : i32, i32
  }
  func.func @transform_6(%arg0: i32, %arg1: i32) -> (i32, i32) {
    %c0_i32 = arith.constant 0 : i32
    %c0_i32_0 = arith.constant 0 : i32
    %c0_i32_1 = arith.constant 0 : i32
    return %c0_i32, %c0_i32_0 : i32, i32
  }
  func.func @transform_7(%arg0: i32, %arg1: i32) -> (i32, i32) {
    %c0_i32 = arith.constant 0 : i32
    %c0_i32_0 = arith.constant 0 : i32
    %c0_i32_1 = arith.constant 0 : i32
    return %c0_i32, %c0_i32_0 : i32, i32
  }
  func.func @transform_8(%arg0: i32, %arg1: i32) -> (i32, i32) {
    %c0_i32 = arith.constant 0 : i32
    %c0_i32_0 = arith.constant 0 : i32
    %c0_i32_1 = arith.constant 0 : i32
    return %c0_i32, %c0_i32_0 : i32, i32
  }
  func.func @transform_9(%arg0: i32, %arg1: i32) -> (i32, i32) {
    %c0_i32 = arith.constant 0 : i32
    %c0_i32_0 = arith.constant 0 : i32
    %c0_i32_1 = arith.constant 0 : i32
    return %c0_i32, %c0_i32_0 : i32, i32
  }
  func.func @transform_10(%arg0: i32, %arg1: i32) -> (i32, i32) {
    %c0_i32 = arith.constant 0 : i32
    %c0_i32_0 = arith.constant 0 : i32
    %c0_i32_1 = arith.constant 0 : i32
    return %c0_i32, %c0_i32_0 : i32, i32
  }
  func.func @transform_11(%arg0: i32, %arg1: i32) -> (i32, i32) {
    %c0_i32 = arith.constant 0 : i32
    %c0_i32_0 = arith.constant 0 : i32
    %c0_i32_1 = arith.constant 0 : i32
    return %c0_i32, %c0_i32_0 : i32, i32
  }
  func.func @transform_12(%arg0: i32, %arg1: i32) -> (i32, i32) {
    %c0_i32 = arith.constant 0 : i32
    %c0_i32_0 = arith.constant 0 : i32
    %c0_i32_1 = arith.constant 0 : i32
    return %c0_i32, %c0_i32_0 : i32, i32
  }
  func.func @transform_13(%arg0: i32, %arg1: i32) -> (i32, i32) {
    %c0_i32 = arith.constant 0 : i32
    %c0_i32_0 = arith.constant 0 : i32
    %c0_i32_1 = arith.constant 0 : i32
    return %c0_i32, %c0_i32_0 : i32, i32
  }
  func.func @transform_14(%arg0: i32, %arg1: i32) -> (i32, i32) {
    %c0_i32 = arith.constant 0 : i32
    %c0_i32_0 = arith.constant 0 : i32
    %c0_i32_1 = arith.constant 0 : i32
    return %c0_i32, %c0_i32_0 : i32, i32
  }
  func.func @transform_15(%arg0: i32, %arg1: i32) -> (i32, i32) {
    %c0_i32 = arith.constant 0 : i32
    %c0_i32_0 = arith.constant 0 : i32
    %c0_i32_1 = arith.constant 0 : i32
    return %c0_i32, %c0_i32_0 : i32, i32
  }
  func.func @transform_16(%arg0: i32, %arg1: i32) -> (i32, i32) {
    %c0_i32 = arith.constant 0 : i32
    %c0_i32_0 = arith.constant 0 : i32
    %c0_i32_1 = arith.constant 0 : i32
    return %c0_i32, %c0_i32_0 : i32, i32
  }
  func.func @transform_17(%arg0: i32, %arg1: i32) -> (i32, i32) {
    %c0_i32 = arith.constant 0 : i32
    %c0_i32_0 = arith.constant 0 : i32
    %c0_i32_1 = arith.constant 0 : i32
    return %c0_i32, %c0_i32_0 : i32, i32
  }
  func.func @transform_18(%arg0: i32, %arg1: i32) -> (i32, i32) {
    %c0_i32 = arith.constant 0 : i32
    %c0_i32_0 = arith.constant 0 : i32
    %c0_i32_1 = arith.constant 0 : i32
    return %c0_i32, %c0_i32_0 : i32, i32
  }
  func.func @transform_19(%arg0: i32, %arg1: i32) -> (i32, i32) {
    %c0_i32 = arith.constant 0 : i32
    %c0_i32_0 = arith.constant 0 : i32
    %c0_i32_1 = arith.constant 0 : i32
    return %c0_i32, %c0_i32_0 : i32, i32
  }
  func.func @transform_20(%arg0: i32, %arg1: i32) -> (i32, i32) {
    %c0_i32 = arith.constant 0 : i32
    %c0_i32_0 = arith.constant 0 : i32
    %c0_i32_1 = arith.constant 0 : i32
    return %c0_i32, %c0_i32_0 : i32, i32
  }
  func.func @transform_21(%arg0: i32, %arg1: i32) -> (i32, i32) {
    %c0_i32 = arith.constant 0 : i32
    %c0_i32_0 = arith.constant 0 : i32
    %c0_i32_1 = arith.constant 0 : i32
    return %c0_i32, %c0_i32_0 : i32, i32
  }
  func.func @transform_22(%arg0: i32, %arg1: i32) -> (i32, i32) {
    %c0_i32 = arith.constant 0 : i32
    %c0_i32_0 = arith.constant 0 : i32
    %c0_i32_1 = arith.constant 0 : i32
    return %c0_i32, %c0_i32_0 : i32, i32
  }
  func.func @transform_23(%arg0: i32, %arg1: i32) -> (i32, i32) {
    %c0_i32 = arith.constant 0 : i32
    %c0_i32_0 = arith.constant 0 : i32
    %c0_i32_1 = arith.constant 0 : i32
    return %c0_i32, %c0_i32_0 : i32, i32
  }
  func.func @transform_24(%arg0: i32, %arg1: i32) -> (i32, i32) {
    %c0_i32 = arith.constant 0 : i32
    %c0_i32_0 = arith.constant 0 : i32
    %c0_i32_1 = arith.constant 0 : i32
    return %c0_i32, %c0_i32_0 : i32, i32
  }
  func.func @transform_25(%arg0: i32, %arg1: i32) -> (i32, i32) {
    %c0_i32 = arith.constant 0 : i32
    %c0_i32_0 = arith.constant 0 : i32
    %c0_i32_1 = arith.constant 0 : i32
    return %c0_i32, %c0_i32_0 : i32, i32
  }
  func.func @transform_26(%arg0: i32, %arg1: i32) -> (i32, i32) {
    %c0_i32 = arith.constant 0 : i32
    %c0_i32_0 = arith.constant 0 : i32
    %c0_i32_1 = arith.constant 0 : i32
    return %c0_i32, %c0_i32_0 : i32, i32
  }
  func.func @transform_27(%arg0: i32, %arg1: i32) -> (i32, i32) {
    %c0_i32 = arith.constant 0 : i32
    %c0_i32_0 = arith.constant 0 : i32
    %c0_i32_1 = arith.constant 0 : i32
    return %c0_i32, %c0_i32_0 : i32, i32
  }
  func.func @transform_28(%arg0: i32, %arg1: i32) -> (i32, i32) {
    %c0_i32 = arith.constant 0 : i32
    %c0_i32_0 = arith.constant 0 : i32
    %c0_i32_1 = arith.constant 0 : i32
    return %c0_i32, %c0_i32_0 : i32, i32
  }
  func.func @transform_29(%arg0: i32, %arg1: i32) -> (i32, i32) {
    %c0_i32 = arith.constant 0 : i32
    %c0_i32_0 = arith.constant 0 : i32
    %c0_i32_1 = arith.constant 0 : i32
    return %c0_i32, %c0_i32_0 : i32, i32
  }
  func.func @transform_30(%arg0: i32, %arg1: i32) -> (i32, i32, i32) {
    %c0_i32 = arith.constant 0 : i32
    %c0_i32_0 = arith.constant 0 : i32
    return %arg0, %arg1, %c0_i32 : i32, i32, i32
  }
  func.func @transform_31(%arg0: i32, %arg1: i32) -> (i32, i32, i32) {
    %c0_i32 = arith.constant 0 : i32
    %c0_i32_0 = arith.constant 0 : i32
    return %arg0, %arg1, %c0_i32 : i32, i32, i32
  }
}

</mosaic_0001>

<bundles_post_ra>
// kernel: tpu_custom_call.1
= control target key start
LH: loop header
LB: loop body
LE: loop exit
PB: predicated region body
PF: predicated region fallthrough
CT: control target
= control target key end

     0   :  { %s4874_s6 = smov 1   ;;  %s4875_s10 = smov 2   ;;  %s5662_s0 = inlined_call_operand.smem [shape: u32[32], index: -1, kind: input, shape index: {}] }
   0x1   :  { %s4946_s5 = sld [smem:[%s5662_s0]]   ;;  %s4876_s14 = smov 3  }
   0x2   :  { %s4951_s9 = sld [smem:[%s5662_s0 + %s4874_s6]]   ;;  %s4877_s18 = smov 4  }
   0x3   :  { %s4956_s13 = sld [smem:[%s5662_s0 + %s4875_s10]]   ;;  %s4878_s22 = smov 5  }
   0x4   :  { %s4961_s17 = sld [smem:[%s5662_s0 + %s4876_s14]]   ;;  %s4879_s26 = smov 6  }
   0x5   :  { %s4966_s21 = sld [smem:[%s5662_s0 + %s4877_s18]]   ;;  %s4880_s30 = smov 7  }
   0x6   :  { %s4971_s25 = sld [smem:[%s5662_s0 + %s4878_s22]]   ;;  %s4881_s4 = smov 8  }
   0x7   :  { %5681 = sst [smem:[#allocation54_spill]] %s4946_s5  ;;  %s4882_s10 = smov 9  }
   0x8   :  { %5682 = sst [smem:[#allocation55_spill]] %s4951_s9  ;;  %s4883_s15 = smov 10  }
   0x9   :  { %5683 = sst [smem:[#allocation56_spill]] %s4956_s13  ;;  %s4884_s20 = smov 11  }
   0xa   :  { %5684 = sst [smem:[#allocation57_spill]] %s4961_s17  ;;  %s4886_s1 = smov 13  }
   0xb   :  { %s4976_s29 = sld [smem:[%s5662_s0 + %s4879_s26]]   ;;  %s4885_s26 = smov 12  }
   0xc   :  { %5685 = sst [smem:[#allocation58_spill]] %s4971_s25  ;;  %s4887_s7 = smov 14  }
   0xd   :  { %s4981_s3 = sld [smem:[%s5662_s0 + %s4880_s30]]   ;;  %s4889_s22 = smov 16  }
   0xe   :  { %s4986_s8 = sld [smem:[%s5662_s0 + %s4881_s4]]   ;;  %s4890_s28 = smov 17  }
   0xf   :  { %s4991_s14 = sld [smem:[%s5662_s0 + %s4882_s10]]  }
  0x10   :  { %s4996_s19 = sld [smem:[%s5662_s0 + %s4883_s15]]   ;;  %s4888_s15 = smov 15  }
  0x11   :  { %s5001_s24 = sld [smem:[%s5662_s0 + %s4884_s20]]  }
  0x12   :  { %s5006_s30 = sld [smem:[%s5662_s0 + %s4885_s26]]  }
  0x13   :  { %5686 = sst [smem:[#allocation59_spill]] %s4981_s3 }
  0x14   :  { %5687 = sst [smem:[#allocation60_spill]] %s4986_s8 }
  0x15   :  { %s5011_s6 = sld [smem:[%s5662_s0 + %s4886_s1]]  }
  0x16   :  { %s5016_s12 = sld [smem:[%s5662_s0 + %s4887_s7]]   ;;  %s4891_s7 = smov 18  }
  0x17   :  { %s5021_s20 = sld [smem:[%s5662_s0 + %s4888_s15]]   ;;  %s4892_s15 = smov 19  }
  0x18   :  { %s5026_s27 = sld [smem:[%s5662_s0 + %s4889_s22]]   ;;  %s4893_s22 = smov 20  }
  0x19   :  { %s5031_s4 = sld [smem:[%s5662_s0 + %s4890_s28]]   ;;  %s4894_s28 = smov 21  }
  0x1a   :  { %s5036_s17 = sld [smem:[%s5662_s0 + %s4891_s7]]   ;;  %s4895_s7 = smov 22  }
  0x1b   :  { %5688 = sst [smem:[#allocation61_spill]] %s5011_s6 }
  0x1c   :  { %s5041_s8 = sld [smem:[%s5662_s0 + %s4892_s15]]   ;;  %s4896_s15 = smov 23  }
  0x1d   :  { %5689 = sst [smem:[#allocation62_spill]] %s5021_s20 }
  0x1e   :  { %5690 = sst [smem:[#allocation63_spill]] %s5026_s27 }
  0x1f   :  { %5691 = sst [smem:[#allocation64_spill]] %s5031_s4 }
  0x20   :  { %5692 = sst [smem:[#allocation65_spill]] %s5036_s17 }
  0x21   :  { %s5046_s27 = sld [smem:[%s5662_s0 + %s4893_s22]]   ;;  %s4897_s22 = smov 24  }
  0x22   :  { %s5051_s13 = sld [smem:[%s5662_s0 + %s4894_s28]]   ;;  %s4898_s28 = smov 25  }
  0x23   :  { %s5056_s5 = sld [smem:[%s5662_s0 + %s4895_s7]]   ;;  %s4899_s7 = smov 26  }
  0x24   :  { %s5061_s9 = sld [smem:[%s5662_s0 + %s4896_s15]]   ;;  %s4900_s15 = smov 27  }
  0x25   :  { %s5071_s17 = sld [smem:[%s5662_s0 + %s4898_s28]]   ;;  %s4902_s28 = smov 29  }
  0x26   :  { %s5081_s20 = sld [smem:[%s5662_s0 + %s4900_s15]]   ;;  %s4904_s15 = smov 31  }
  0x27   :  { %5693 = sst [smem:[#allocation66_spill]] %s5046_s27 }
  0x28   :  { %s5066_s27 = sld [smem:[%s5662_s0 + %s4897_s22]]   ;;  %s4901_s22 = smov 28  }
  0x29   :  { %5694 = sst [smem:[#allocation67_spill]] %s5056_s5 }
  0x2a   :  { %s5076_s5 = sld [smem:[%s5662_s0 + %s4899_s7]]   ;;  %s4903_s7 = smov 30  }
  0x2b   :  { %5696 = sst [smem:[#allocation69_spill]] %s5071_s17 }
  0x2c   :  { %5698 = sst [smem:[#allocation71_spill]] %s5081_s20 }
  0x2d   :  { %s5091_s17 = sld [smem:[%s5662_s0 + %s4902_s28]]  }
  0x2e   :  { %5695 = sst [smem:[#allocation68_spill]] %s5066_s27 }
  0x2f   :  { %s5086_s27 = sld [smem:[%s5662_s0 + %s4901_s22]]  }
  0x30   :  { %5697 = sst [smem:[#allocation70_spill]] %s5076_s5 }
  0x31   :  { %s5096_s5 = sld [smem:[%s5662_s0 + %s4903_s7]]  }
  0x32   :  { %s5101_s20 = sld [smem:[%s5662_s0 + %s4904_s15]]  }
  0x33   :  { %5699 = sst [smem:[#allocation72_spill]] %s5091_s17 }
  0x37   :  { %5700 = sst [smem:[#allocation73_spill]] %s5096_s5 }
  0x38   :  { %69 = vsyncpa [#allocation7], 0 }
  0x39   :  { %70 = vsyncpa [#allocation10], 0 }
  0x3a   :  { %71 = vsyncpa [#allocation13], 0 }
  0x3b   :  { %72 = vsyncpa [#allocation16], 0 }
  0x3c   :  { %73 = vsyncpa [#allocation19], 0 }
  0x3d   :  { %74 = vsyncpa [#allocation22], 0 }
  0x3e   :  { %75 = vsyncpa [#allocation25], 0 }
  0x3f   :  { %76 = vsyncpa [#allocation28], 0 }
  0x40   :  { %77 = vsyncpa [#allocation31], 0 }
  0x41   :  { %78 = vsyncpa [#allocation34], 0 }
  0x42   :  { %79 = vsyncpa [#allocation37], 0 }
  0x43   :  { %80 = vsyncpa [#allocation8], 0 }
  0x44   :  { %82 = vsyncpa [#allocation8 + $0x1], 0 }
  0x45   :  { %83 = vsyncpa [#allocation40], 0 }
  0x46   :  { %85 = vsyncpa [#allocation40 + $0x1], 0  ;;  %s5103_s22 = smov 0   ;;  %s5105_s23 = smov 0  }
  0x47   :  { %s5107_s0 = smov 0   ;;  %s5109_s26 = smov 0  }
  0x48   :  { %s5111_s28 = smov 0   ;;  %s5113_s1 = smov 0  }
  0x49 LB: > { %5701 = sst [smem:[#allocation74_spill]] %s4852_s22  ;;  %s3465_s2 = sadd.s32 4294967295, %s4872_s1   ;;  %s4872_s1 = sphi %s5113_s1, %s91_s1   ;;  %s4868_s28 = sphi %s5111_s28, %s5747_s28   ;;  %s4864_s26 = sphi %s5109_s26, %s5746_s26   ;;  %s4860_s0 = sphi %s5107_s0, %s5745_s0   ;;  %s4856_s23 = sphi %s5105_s23, %s5749_s23   ;;  %s4852_s22 = sphi %s5103_s22, %s5748_s22  }
  0x4a   : > { %5702 = sst [smem:[#allocation75_spill]] %s4860_s0  ;;  %s3466_s7 = sadd.s32 4294967294, %s4872_s1  }
  0x4b   : > { %5703 = sst [smem:[#allocation76_spill]] %s4868_s28  ;;  %s103_s10 = sadd.s32 1, %s4868_s28 }
  0x4c   : > { %s764_s11 = sadd.s32 1, %s4860_s0  ;;  %p105_p0 = scmp.ge.s32.totalorder %s103_s10, 2 }
  0x4d   : > { %p774_p1 = scmp.ne.s32.totalorder %s4860_s0, %s4856_s23  ;;  %p775_p2 = scmp.eq.s32.totalorder %s3465_s2, 1 }
  0x4e   : > { %p780_p3 = scmp.ne.s32.totalorder %s4856_s23, %s4852_s22  ;;  %s5751_s10 = smov (%p105_p0, %s103_s10), 0 }
  0x4f   : > { %5704 = sst [smem:[#allocation77_spill]] %s5751_s10  ;;  %p5143_p4 = por %p775_p2, %p774_p1 }
  0x50   : > { %p781_p5 = scmp.eq.s32.totalorder %s3466_s7, 1  ;;  %s759_s16 = ssub.s32 %s4868_s28, %s5751_s10 }
  0x51   : > { %s5705_s15 = scalar_select %p5143_p4, 1, 0 }
  0x52   : > { %p3467_p6 = scmp.ge.s32.totalorder %s4872_s1, 1  ;;  %p762_p7 = scmp.eq.s32.totalorder %s759_s16, 0 }
  0x53   : > { %p5150_p8 = por %p781_p5, %p780_p3  ;;  %p816_p9 = scmp.lt.s32.totalorder %s4872_s1, 3 }
  0x54   : > { %s5156_s5 = scalar_select %p762_p7, %s4860_s0, %s764_s11  }
  0x55   : > { %s5706_s18 = scalar_select %p5150_p8, 1, 0 }
  0x56   : > { %5708 = sst [smem:[#allocation79_spill]] %s5156_s5  ;;  %p5158_p10 = pnand %p3467_p6, %p816_p9 }
  0x57   : > { %5707 = sst [smem:[#allocation78_spill]] %s5706_s18  ;;  %p5162_p11 = scmp.eq.s32.totalorder %s3465_s2, 0 }
  0x58   : > { %s5709_s22 = scalar_select %p5158_p10, 1, 0 }
  0x59   : > { %s5710_s17 = scalar_select %p5162_p11, 1, 0 }
  0x5a   : > { %p3917_p12 = pneg %p5158_p10  ;;  %s4905_s7 = smov [#allocation9]  }
  0x5b   : > { %s840_s16 = sshll.u32 %s4905_s7, 4  ;;  %s4906_s10 = smov [#allocation12]   ;;  %s841_s16 = int_to_ptr.vmem [resolvable:$true] %s840_s16 }
  0x5c   : > { %s864_s28 = sshll.u32 %s4906_s10, 4  ;;  %p5170_p13 = pnand %p5162_p11, %p3917_p12  ;;  %s865_s28 = int_to_ptr.vmem [resolvable:$true] %s864_s28 }
  0x5d   : > { %s4213_s5 = scalar_lea.vmem %s841_s16, 16  ;;  %s4220_s7 = scalar_lea.vmem %s841_s16, 32 }
  0x5e   : > { %p5176_p0 = pneg %p5170_p13  ;;  %p4214_p1 = scmp.ne.s32.totalorder %s841_s16, %s4213_s5 }
  0x5f   : > { %p4221_p5 = scmp.lt.s32.totalorder %s841_s16, %s841_s16  ;;  %p4222_p6 = scmp.lt.s32.totalorder %s4220_s7, %s4213_s5 }
  0x60   : > { %p4216_p2 = pnand %p4214_p1, %p5176_p0 }
  0x61   : > { %p4223_p7 = por %p4222_p6, %p4221_p5 }
  0x62   : > { %p4217_p3 = pneg %p4216_p2 }
  0x64   : > { %p4224_p9 = pnand %p4223_p7, %p4217_p3 }
  0x66   : > { %4227 = shalt.err (!%p4224_p9)
}
  0x67   : > { %s5713_s25 = sld [smem:[#allocation58_spill]]  ;;  %s4239_s10 = scalar_lea.vmem %s865_s28, 16 }
  0x68   : > { %p4240_p12 = scmp.ne.s32.totalorder %s865_s28, %s4239_s10  ;;  %s4246_s0 = scalar_lea.vmem %s865_s28, 32 }
  0x69   : > { %p4247_p11 = scmp.lt.s32.totalorder %s865_s28, %s865_s28  ;;  %p4248_p1 = scmp.lt.s32.totalorder %s4246_s0, %s4239_s10 }
  0x6a   : > { %p4242_p8 = pnand %p4240_p12, %p5176_p0 }
  0x6b   : > { %p4249_p2 = por %p4248_p1, %p4247_p11 }
  0x6c   : > { %p4243_p4 = pneg %p4242_p8 }
  0x6d   : > { %3923 = dma.hbm_to_vmem [thread:$0]  (!%p5170_p13), %s5713_s25, 16, %s841_s16, [#allocation10]  }
  0x6e   : > { %p4250_p10 = pnand %p4249_p2, %p4243_p4 }
  0x70   : > { %4253 = shalt.err (!%p4250_p10)
}
  0x71   : > { %s5714_s3 = sld [smem:[#allocation59_spill]]  ;;  %s4907_s5 = smov [#allocation15]  }
  0x72   : > { %s888_s7 = sshll.u32 %s4907_s5, 4  ;;  %s4908_s16 = smov [#allocation18]   ;;  %s889_s7 = int_to_ptr.vmem [resolvable:$true] %s888_s7 }
  0x73   : > { %s912_s25 = sshll.u32 %s4908_s16, 4  ;;  %s4265_s18 = scalar_lea.vmem %s889_s7, 256  ;;  %s913_s25 = int_to_ptr.vmem [resolvable:$true] %s912_s25 }
  0x74   : > { %p4266_p3 = scmp.ne.s32.totalorder %s889_s7, %s4265_s18  ;;  %p4273_p6 = scmp.lt.s32.totalorder %s889_s7, %s889_s7 }
  0x75   : > { %p4274_p7 = scmp.lt.s32.totalorder %s4265_s18, %s4265_s18 }
  0x76   : > { %p4268_p8 = pnand %p4266_p3, %p5176_p0 }
  0x77   : > { %3929 = dma.hbm_to_vmem [thread:$0]  (!%p5170_p13), %s5714_s3, 16, %s865_s28, [#allocation13]  }
  0x78   : > { %p4269_p5 = pneg %p4268_p8  ;;  %p4275_p11 = por %p4274_p7, %p4273_p6 }
  0x7a   : > { %p4276_p4 = pnand %p4275_p11, %p4269_p5 }
  0x7c   : > { %4279 = shalt.err (!%p4276_p4)
}
  0x7d   : > { %s5676_s0 = smov 64   ;;  %s5678_s28 = smov 4  }
  0x7e   : > { %3935 = dma.hbm_to_vmem [thread:$0]  (!%p5170_p13), %s4996_s19, 256, %s889_s7, [#allocation16], %s5676_s0, %s5676_s0, %s5678_s28  }
  0x7f   : > { %s4291_s10 = scalar_lea.vmem %s913_s25, 256  ;;  %p4299_p1 = scmp.lt.s32.totalorder %s913_s25, %s913_s25 }
  0x80   : > { %p4292_p10 = scmp.ne.s32.totalorder %s913_s25, %s4291_s10  ;;  %p4300_p2 = scmp.lt.s32.totalorder %s4291_s10, %s4291_s10 }
  0x82   : > { %p4294_p9 = pnand %p4292_p10, %p5176_p0  ;;  %p4301_p3 = por %p4300_p2, %p4299_p1 }
  0x84   : > { %p4295_p12 = pneg %p4294_p9 }
  0x86   : > { %p4302_p8 = pnand %p4301_p3, %p4295_p12 }
  0x88   : > { %4305 = shalt.err (!%p4302_p8)
}
  0x89   : > { %3941 = dma.hbm_to_vmem [thread:$0]  (!%p5170_p13), %s5006_s30, 256, %s913_s25, [#allocation19], %s5676_s0, %s5676_s0, %s5678_s28  }
  0x8a   : > { %s4911_s18 = smov [#allocation21]   ;;  %s4912_s7 = smov [#allocation24]  }
  0x8b   : > { %s937_s5 = sshll.u32 %s4911_s18, 4  ;;  %s962_s16 = sshll.u32 %s4912_s7, 4  ;;  %s938_s5 = int_to_ptr.vmem [resolvable:$true] %s937_s5  ;;  %s963_s16 = int_to_ptr.vmem [resolvable:$true] %s962_s16 }
  0x8c   : > { %s4317_s3 = scalar_lea.vmem %s938_s5, 16  ;;  %s4324_s10 = scalar_lea.vmem %s938_s5, 32 }
  0x8d   : > { %p4318_p5 = scmp.ne.s32.totalorder %s938_s5, %s4317_s3  ;;  %p4325_p11 = scmp.lt.s32.totalorder %s938_s5, %s938_s5 }
  0x8e   : > { %p4326_p4 = scmp.lt.s32.totalorder %s4324_s10, %s4317_s3 }
  0x8f   : > { %p4320_p6 = pnand %p4318_p5, %p5176_p0 }
  0x90   : > { %p4327_p10 = por %p4326_p4, %p4325_p11 }
  0x91   : > { %p4321_p7 = pneg %p4320_p6 }
  0x93   : > { %p4328_p9 = pnand %p4327_p10, %p4321_p7 }
  0x95   : > { %4331 = shalt.err (!%p4328_p9)
}
  0x96   : > { %3947 = dma.hbm_to_vmem [thread:$0]  (!%p5170_p13), %s5016_s12, 16, %s938_s5, [#allocation22]  }
  0x97   : > { %s4343_s25 = scalar_lea.vmem %s963_s16, 16  ;;  %s4350_s18 = scalar_lea.vmem %s963_s16, 32 }
  0x98   : > { %p4344_p12 = scmp.ne.s32.totalorder %s963_s16, %s4343_s25  ;;  %p4351_p3 = scmp.lt.s32.totalorder %s963_s16, %s963_s16 }
  0x99   : > { %p4352_p8 = scmp.lt.s32.totalorder %s4350_s18, %s4343_s25 }
  0x9a   : > { %p4346_p1 = pnand %p4344_p12, %p5176_p0 }
  0x9b   : > { %p4353_p5 = por %p4352_p8, %p4351_p3 }
  0x9c   : > { %p4347_p2 = pneg %p4346_p1 }
  0x9e   : > { %p4354_p6 = pnand %p4353_p5, %p4347_p2 }
  0xa0   : > { %4357 = shalt.err (!%p4354_p6)
}
  0xa1   : > { %s5715_s4 = sld [smem:[#allocation64_spill]]  ;;  %s4913_s3 = smov [#allocation27]  }
  0xa2   : > { %s986_s7 = sshll.u32 %s4913_s3, 4  ;;  %s4914_s5 = smov [#allocation30]   ;;  %s987_s7 = int_to_ptr.vmem [resolvable:$true] %s986_s7 }
  0xa3   : > { %s1010_s10 = sshll.u32 %s4914_s5, 4  ;;  %s4369_s0 = scalar_lea.vmem %s987_s7, 16  ;;  %s1011_s10 = int_to_ptr.vmem [resolvable:$true] %s1010_s10 }
  0xa4   : > { %p4370_p7 = scmp.ne.s32.totalorder %s987_s7, %s4369_s0  ;;  %s4376_s28 = scalar_lea.vmem %s987_s7, 32 }
  0xa5   : > { %p4377_p10 = scmp.lt.s32.totalorder %s987_s7, %s987_s7  ;;  %p4378_p9 = scmp.lt.s32.totalorder %s4376_s28, %s4369_s0 }
  0xa6   : > { %p4372_p11 = pnand %p4370_p7, %p5176_p0 }
  0xa7   : > { %3953 = dma.hbm_to_vmem [thread:$0]  (!%p5170_p13), %s5715_s4, 16, %s963_s16, [#allocation25]  }
  0xa8   : > { %p4373_p4 = pneg %p4372_p11  ;;  %p4379_p12 = por %p4378_p9, %p4377_p10 }
  0xaa   : > { %p4380_p1 = pnand %p4379_p12, %p4373_p4 }
  0xac   : > { %4383 = shalt.err (!%p4380_p1)
}
  0xad   : > { %3959 = dma.hbm_to_vmem [thread:$0]  (!%p5170_p13), %s5041_s8, 16, %s987_s7, [#allocation28]  }
  0xae   : > { %s4395_s16 = scalar_lea.vmem %s1011_s10, 16  ;;  %s4402_s25 = scalar_lea.vmem %s1011_s10, 32 }
  0xaf   : > { %p4396_p2 = scmp.ne.s32.totalorder %s1011_s10, %s4395_s16  ;;  %p4403_p5 = scmp.lt.s32.totalorder %s1011_s10, %s1011_s10 }
  0xb0   : > { %p4404_p6 = scmp.lt.s32.totalorder %s4402_s25, %s4395_s16 }
  0xb1   : > { %p4398_p3 = pnand %p4396_p2, %p5176_p0 }
  0xb2   : > { %p4405_p7 = por %p4404_p6, %p4403_p5 }
  0xb3   : > { %p4399_p8 = pneg %p4398_p3 }
  0xb5   : > { %p4406_p11 = pnand %p4405_p7, %p4399_p8 }
  0xb7   : > { %4409 = shalt.err (!%p4406_p11)
}
  0xb8   : > { %3965 = dma.hbm_to_vmem [thread:$0]  (!%p5170_p13), %s5051_s13, 16, %s1011_s10, [#allocation31]  }
  0xb9   : > { %s4915_s0 = smov [#allocation33]  }
  0xba   : > { %s1034_s28 = sshll.u32 %s4915_s0, 4  ;;  %s1035_s28 = int_to_ptr.vmem [resolvable:$true] %s1034_s28 }
  0xbb   : > { %s4421_s18 = scalar_lea.vmem %s1035_s28, 16  ;;  %s4428_s3 = scalar_lea.vmem %s1035_s28, 32 }
  0xbc   : > { %p4422_p4 = scmp.ne.s32.totalorder %s1035_s28, %s4421_s18  ;;  %p4429_p12 = scmp.lt.s32.totalorder %s1035_s28, %s1035_s28 }
  0xbd   : > { %p4430_p1 = scmp.lt.s32.totalorder %s4428_s3, %s4421_s18 }
  0xbe   : > { %p4424_p10 = pnand %p4422_p4, %p5176_p0 }
  0xbf   : > { %p4431_p2 = por %p4430_p1, %p4429_p12 }
  0xc0   : > { %p4425_p9 = pneg %p4424_p10 }
  0xc2   : > { %p4432_p3 = pnand %p4431_p2, %p4425_p9 }
  0xc4   : > { %4435 = shalt.err (!%p4432_p3)
}
  0xc5   : > { %3971 = dma.hbm_to_vmem [thread:$0]  (!%p5170_p13), %s5061_s9, 16, %s1035_s28, [#allocation34]  }
  0xc6   : > { %s4916_s7 = smov [#allocation6]   ;;  %s4917_s10 = smov [#allocation11]  }
  0xc7   : > { %s829_s5 = sshll.u32 %s4916_s7, 4  ;;  %s850_s16 = sshll.u32 %s4917_s10, 4  ;;  %s830_s5 = int_to_ptr.vmem [resolvable:$true] %s829_s5  ;;  %s851_s16 = int_to_ptr.vmem [resolvable:$true] %s850_s16 }
  0xc8   : > { %s4447_s25 = scalar_lea.vmem %s830_s5, 16  ;;  %s4454_s0 = scalar_lea.vmem %s830_s5, 32 }
  0xc9   : > { %p4448_p8 = scmp.ne.s32.totalorder %s830_s5, %s4447_s25  ;;  %p4455_p7 = scmp.lt.s32.totalorder %s830_s5, %s830_s5 }
  0xca   : > { %p4456_p11 = scmp.lt.s32.totalorder %s4454_s0, %s4447_s25 }
  0xcb   : > { %p4450_p5 = pnand %p4448_p8, %p5176_p0 }
  0xcc   : > { %p4457_p4 = por %p4456_p11, %p4455_p7 }
  0xcd   : > { %p4451_p6 = pneg %p4450_p5 }
  0xcf   : > { %p4458_p10 = pnand %p4457_p4, %p4451_p6 }
  0xd1   : > { %4461 = shalt.err (!%p4458_p10)
}
  0xd2   : > { %3920 = dma.hbm_to_vmem [thread:$0]  (!%p5170_p13), %s4966_s21, 16, %s830_s5, [#allocation7]  }
  0xd3   : > { %s4473_s28 = scalar_lea.vmem %s851_s16, 256  ;;  %p4481_p2 = scmp.lt.s32.totalorder %s851_s16, %s851_s16 }
  0xd4   : > { %p4474_p9 = scmp.ne.s32.totalorder %s851_s16, %s4473_s28  ;;  %p4482_p3 = scmp.lt.s32.totalorder %s4473_s28, %s4473_s28 }
  0xd6   : > { %p4476_p12 = pnand %p4474_p9, %p5176_p0  ;;  %p4483_p8 = por %p4482_p3, %p4481_p2 }
  0xd8   : > { %p4477_p1 = pneg %p4476_p12 }
  0xda   : > { %p4484_p5 = pnand %p4483_p8, %p4477_p1 }
  0xdc   : > { %4487 = shalt.err (!%p4484_p5)
}
  0xdd   : > { %s5716_s18 = smov 4   ;;  %s5717_s3 = smov 64  }
  0xde   : > { %3926 = dma.hbm_to_vmem [thread:$0]  (!%p5170_p13), %s4976_s29, 256, %s851_s16, [#allocation10], %s5717_s3, %s5717_s3, %s5716_s18  }
  0xdf   : > { %s4918_s7 = smov [#allocation14]   ;;  %s4919_s10 = smov [#allocation17]  }
  0xe0   : > { %s878_s5 = sshll.u32 %s4918_s7, 4  ;;  %s902_s25 = sshll.u32 %s4919_s10, 4  ;;  %s879_s5 = int_to_ptr.vmem [resolvable:$true] %s878_s5  ;;  %s903_s25 = int_to_ptr.vmem [resolvable:$true] %s902_s25 }
  0xe1   : > { %s4499_s0 = scalar_lea.vmem %s879_s5, 16  ;;  %s4506_s28 = scalar_lea.vmem %s879_s5, 32 }
  0xe2   : > { %p4500_p6 = scmp.ne.s32.totalorder %s879_s5, %s4499_s0  ;;  %p4507_p4 = scmp.lt.s32.totalorder %s879_s5, %s879_s5 }
  0xe3   : > { %p4508_p10 = scmp.lt.s32.totalorder %s4506_s28, %s4499_s0 }
  0xe4   : > { %p4502_p7 = pnand %p4500_p6, %p5176_p0 }
  0xe5   : > { %p4509_p9 = por %p4508_p10, %p4507_p4 }
  0xe6   : > { %p4503_p11 = pneg %p4502_p7 }
  0xe8   : > { %p4510_p12 = pnand %p4509_p9, %p4503_p11 }
  0xea   : > { %4513 = shalt.err (!%p4510_p12)
}
  0xeb   : > { %3932 = dma.hbm_to_vmem [thread:$0]  (!%p5170_p13), %s4991_s14, 16, %s879_s5, [#allocation13]  }
  0xec   : > { %s4525_s16 = scalar_lea.vmem %s903_s25, 16  ;;  %s4532_s7 = scalar_lea.vmem %s903_s25, 32 }
  0xed   : > { %p4526_p1 = scmp.ne.s32.totalorder %s903_s25, %s4525_s16  ;;  %p4533_p8 = scmp.lt.s32.totalorder %s903_s25, %s903_s25 }
  0xee   : > { %p4534_p5 = scmp.lt.s32.totalorder %s4532_s7, %s4525_s16 }
  0xef   : > { %p4528_p2 = pnand %p4526_p1, %p5176_p0 }
  0xf0   : > { %p4535_p6 = por %p4534_p5, %p4533_p8 }
  0xf1   : > { %p4529_p3 = pneg %p4528_p2 }
  0xf3   : > { %p4536_p7 = pnand %p4535_p6, %p4529_p3 }
  0xf5   : > { %4539 = shalt.err (!%p4536_p7)
}
  0xf6   : > { %3938 = dma.hbm_to_vmem [thread:$0]  (!%p5170_p13), %s5001_s24, 16, %s903_s25, [#allocation16]  }
  0xf7   : > { %s4920_s10 = smov [#allocation20]   ;;  %s4921_s28 = smov [#allocation23]  }
  0xf8   : > { %s926_s0 = sshll.u32 %s4920_s10, 4  ;;  %s948_s5 = sshll.u32 %s4921_s28, 4  ;;  %s927_s0 = int_to_ptr.vmem [resolvable:$true] %s926_s0  ;;  %s949_s5 = int_to_ptr.vmem [resolvable:$true] %s948_s5 }
  0xf9   : > { %s4551_s4 = scalar_lea.vmem %s927_s0, 16  ;;  %s4558_s16 = scalar_lea.vmem %s927_s0, 32 }
  0xfa   : > { %p4552_p11 = scmp.ne.s32.totalorder %s927_s0, %s4551_s4  ;;  %p4559_p9 = scmp.lt.s32.totalorder %s927_s0, %s927_s0 }
  0xfb   : > { %p4560_p12 = scmp.lt.s32.totalorder %s4558_s16, %s4551_s4 }
  0xfc   : > { %p4554_p4 = pnand %p4552_p11, %p5176_p0 }
  0xfd   : > { %p4561_p1 = por %p4560_p12, %p4559_p9 }
  0xfe   : > { %p4555_p10 = pneg %p4554_p4 }
 0x100   : > { %p4562_p2 = pnand %p4561_p1, %p4555_p10 }
 0x102   : > { %4565 = shalt.err (!%p4562_p2)
}
 0x103   : > { %s5718_s6 = sld [smem:[#allocation61_spill]]  ;;  %s4577_s25 = scalar_lea.vmem %s949_s5, 16 }
 0x104   : > { %p4578_p3 = scmp.ne.s32.totalorder %s949_s5, %s4577_s25  ;;  %s4584_s7 = scalar_lea.vmem %s949_s5, 32 }
 0x105   : > { %p4585_p6 = scmp.lt.s32.totalorder %s949_s5, %s949_s5  ;;  %p4586_p7 = scmp.lt.s32.totalorder %s4584_s7, %s4577_s25 }
 0x106   : > { %p4580_p8 = pnand %p4578_p3, %p5176_p0 }
 0x107   : > { %p4587_p11 = por %p4586_p7, %p4585_p6 }
 0x108   : > { %p4581_p5 = pneg %p4580_p8 }
 0x109   : > { %3944 = dma.hbm_to_vmem [thread:$0]  (!%p5170_p13), %s5718_s6, 16, %s927_s0, [#allocation19]  }
 0x10a   : > { %p4588_p4 = pnand %p4587_p11, %p4581_p5 }
 0x10c   : > { %4591 = shalt.err (!%p4588_p4)
}
 0x10d   : > { %s5719_s4 = sld [smem:[#allocation62_spill]]  ;;  %s4922_s10 = smov [#allocation26]  }
 0x10e   : > { %s972_s28 = sshll.u32 %s4922_s10, 4  ;;  %s4923_s16 = smov [#allocation29]   ;;  %s973_s28 = int_to_ptr.vmem [resolvable:$true] %s972_s28 }
 0x10f   : > { %s996_s0 = sshll.u32 %s4923_s16, 4  ;;  %s4603_s6 = scalar_lea.vmem %s973_s28, 256  ;;  %s997_s0 = int_to_ptr.vmem [resolvable:$true] %s996_s0 }
 0x110   : > { %p4604_p10 = scmp.ne.s32.totalorder %s973_s28, %s4603_s6  ;;  %p4611_p1 = scmp.lt.s32.totalorder %s973_s28, %s973_s28 }
 0x111   : > { %p4612_p2 = scmp.lt.s32.totalorder %s4603_s6, %s4603_s6 }
 0x112   : > { %p4606_p9 = pnand %p4604_p10, %p5176_p0 }
 0x113   : > { %3950 = dma.hbm_to_vmem [thread:$0]  (!%p5170_p13), %s5719_s4, 16, %s949_s5, [#allocation22]  }
 0x114   : > { %p4607_p12 = pneg %p4606_p9  ;;  %p4613_p3 = por %p4612_p2, %p4611_p1 }
 0x116   : > { %p4614_p8 = pnand %p4613_p3, %p4607_p12 }
 0x118   : > { %4617 = shalt.err (!%p4614_p8)
}
 0x119   : > { %s5720_s5 = sld [smem:[#allocation65_spill]]  ;;  %s4629_s25 = scalar_lea.vmem %s997_s0, 256 }
 0x11a   : > { %p4630_p5 = scmp.ne.s32.totalorder %s997_s0, %s4629_s25  ;;  %p4637_p11 = scmp.lt.s32.totalorder %s997_s0, %s997_s0 }
 0x11b   : > { %p4638_p4 = scmp.lt.s32.totalorder %s4629_s25, %s4629_s25 }
 0x11c   : > { %p4632_p6 = pnand %p4630_p5, %p5176_p0 }
 0x11d   : > { %p4639_p10 = por %p4638_p4, %p4637_p11 }
 0x11e   : > { %p4633_p7 = pneg %p4632_p6 }
 0x11f   : > { %3956 = dma.hbm_to_vmem [thread:$0]  (!%p5170_p13), %s5720_s5, 256, %s973_s28, [#allocation25], %s5717_s3, %s5717_s3, %s5716_s18  }
 0x120   : > { %p4640_p9 = pnand %p4639_p10, %p4633_p7 }
 0x122   : > { %4643 = shalt.err (!%p4640_p9)
}
 0x123   : > { %s5721_s6 = sld [smem:[#allocation66_spill]]  ;;  %s4924_s7 = smov [#allocation32]  }
 0x124   : > { %s1020_s4 = sshll.u32 %s4924_s7, 4  ;;  %s4925_s10 = smov [#allocation35]   ;;  %s1021_s4 = int_to_ptr.vmem [resolvable:$true] %s1020_s4 }
 0x125   : > { %s1045_s28 = sshll.u32 %s4925_s10, 4  ;;  %s4655_s16 = scalar_lea.vmem %s1021_s4, 256  ;;  %s1046_s28 = int_to_ptr.vmem [resolvable:$true] %s1045_s28 }
 0x126   : > { %p4656_p12 = scmp.ne.s32.totalorder %s1021_s4, %s4655_s16  ;;  %p4663_p3 = scmp.lt.s32.totalorder %s1021_s4, %s1021_s4 }
 0x127   : > { %p4664_p8 = scmp.lt.s32.totalorder %s4655_s16, %s4655_s16 }
 0x128   : > { %p4658_p1 = pnand %p4656_p12, %p5176_p0 }
 0x129   : > { %3962 = dma.hbm_to_vmem [thread:$0]  (!%p5170_p13), %s5721_s6, 256, %s997_s0, [#allocation28], %s5717_s3, %s5717_s3, %s5716_s18  }
 0x12a   : > { %p4659_p2 = pneg %p4658_p1  ;;  %p4665_p5 = por %p4664_p8, %p4663_p3 }
 0x12c   : > { %p4666_p6 = pnand %p4665_p5, %p4659_p2 }
 0x12e   : > { %4669 = shalt.err (!%p4666_p6)
}
 0x12f   : > { %s5722_s0 = sld [smem:[#allocation67_spill]]  ;;  %s4681_s5 = scalar_lea.vmem %s1046_s28, 16 }
 0x130   : > { %p4682_p7 = scmp.ne.s32.totalorder %s1046_s28, %s4681_s5  ;;  %s4688_s25 = scalar_lea.vmem %s1046_s28, 32 }
 0x131   : > { %p4689_p10 = scmp.lt.s32.totalorder %s1046_s28, %s1046_s28  ;;  %p4690_p9 = scmp.lt.s32.totalorder %s4688_s25, %s4681_s5 }
 0x132   : > { %p4684_p11 = pnand %p4682_p7, %p5176_p0 }
 0x133   : > { %p4691_p12 = por %p4690_p9, %p4689_p10 }
 0x134   : > { %p4685_p4 = pneg %p4684_p11 }
 0x135   : > { %3968 = dma.hbm_to_vmem [thread:$0]  (!%p5170_p13), %s5722_s0, 256, %s1021_s4, [#allocation31], %s5717_s3, %s5717_s3, %s5716_s18  }
 0x136   : > { %p4692_p1 = pnand %p4691_p12, %p4685_p4 }
 0x138   : > { %4695 = shalt.err (!%p4692_p1)
}
 0x139   : > { %s5723_s6 = sld [smem:[#allocation68_spill]]  ;;  %s4926_s7 = smov [#allocation36]  }
 0x13a   : > { %s1056_s10 = sshll.u32 %s4926_s7, 4  ;;  %s1057_s10 = int_to_ptr.vmem [resolvable:$true] %s1056_s10 }
 0x13b   : > { %s4707_s18 = scalar_lea.vmem %s1057_s10, 16  ;;  %s4714_s3 = scalar_lea.vmem %s1057_s10, 32 }
 0x13c   : > { %p4708_p2 = scmp.ne.s32.totalorder %s1057_s10, %s4707_s18  ;;  %p4715_p5 = scmp.lt.s32.totalorder %s1057_s10, %s1057_s10 }
 0x13d   : > { %p4716_p6 = scmp.lt.s32.totalorder %s4714_s3, %s4707_s18 }
 0x13e   : > { %p4710_p3 = pnand %p4708_p2, %p5176_p0 }
 0x13f   : > { %3974 = dma.hbm_to_vmem [thread:$0]  (!%p5170_p13), %s5723_s6, 16, %s1046_s28, [#allocation34]  }
 0x140   : > { %p4711_p8 = pneg %p4710_p3  ;;  %p4717_p7 = por %p4716_p6, %p4715_p5 }
 0x142   : > { %p4718_p11 = pnand %p4717_p7, %p4711_p8 }
 0x144   : > { %4721 = shalt.err (!%p4718_p11)
}
 0x145   : > { %s5724_s4 = sld [smem:[#allocation69_spill]]  ;;  %p5725_p4 = scmp.ne.s32.totalorder %s5709_s22, 0 }
 0x146   : > { %p5726_p10 = scmp.ne.s32.totalorder (!%p5725_p4), %s5710_s17, 0 }
 0x147   : > { %1111 = sbr.rel (%p5725_p4) target bundleno = 4117 (0x1015), region = 140 }
 0x14b   : > { %3977 = dma.hbm_to_vmem [thread:$0]  (!%p5170_p13), %s5724_s4, 16, %s1057_s10, [#allocation37]  }
 0x14c   : > { %4799 = dma.done.wait (%p5726_p10), [#allocation7], 16  }
 0x14d   : > { %4801 = vsyncadd (%p5726_p10), [#allocation7], 4294967280 }
 0x14e   : > { %4803 = dma.done.wait (%p5726_p10), [#allocation10], 272  }
 0x14f   : > { %4805 = vsyncadd (%p5726_p10), [#allocation10], 4294967024 }
 0x150   : > { %4807 = dma.done.wait (%p5726_p10), [#allocation13], 32  }
 0x151   : > { %4809 = vsyncadd (%p5726_p10), [#allocation13], 4294967264 }
 0x152   : > { %4811 = dma.done.wait (%p5726_p10), [#allocation16], 272  }
 0x153   : > { %4813 = vsyncadd (%p5726_p10), [#allocation16], 4294967024 }
 0x154   : > { %4815 = dma.done.wait (%p5726_p10), [#allocation19], 272  }
 0x155   : > { %4817 = vsyncadd (%p5726_p10), [#allocation19], 4294967024 }
 0x156   : > { %4819 = dma.done.wait (%p5726_p10), [#allocation22], 32  }
 0x157   : > { %4821 = vsyncadd (%p5726_p10), [#allocation22], 4294967264 }
 0x158   : > { %4823 = dma.done.wait (%p5726_p10), [#allocation25], 272  }
 0x159   : > { %4825 = vsyncadd (%p5726_p10), [#allocation25], 4294967024 }
 0x15a   : > { %4827 = dma.done.wait (%p5726_p10), [#allocation28], 272  }
 0x15b   : > { %4829 = vsyncadd (%p5726_p10), [#allocation28], 4294967024 }
 0x15c   : > { %4831 = dma.done.wait (%p5726_p10), [#allocation31], 272  }
 0x15d   : > { %4833 = vsyncadd (%p5726_p10), [#allocation31], 4294967024 }
 0x15e   : > { %4835 = dma.done.wait (%p5726_p10), [#allocation34], 32  }
 0x15f   : > { %4837 = vsyncadd (%p5726_p10), [#allocation34], 4294967264 }
 0x160   : > { %4839 = dma.done.wait (%p5726_p10), [#allocation37], 16  }
 0x161   : > { %4841 = vsyncadd (%p5726_p10), [#allocation37], 4294967280  ;;  %s5727_s22 = sld [smem:[#allocation55_spill]]  ;;  %p1285_p13 = scmp.lt.s32.totalorder %s4864_s26, 1  ;;  %vm1391_vm0 = vcmask 261120   ;;  %v4136_v14 = vld [vmem:[#allocation26 + $0x8] sm:$0xff]  }
 0x162   : > { %s5728_s11 = sld [smem:[#allocation54_spill]]  ;;  %v4927_v15 = vmov 0.0   ;;  %v4137_v17 = vld [vmem:[#allocation26] sm:$0xff]   ;;  %vm4928_vm1 = vmmov 0   ;;  %v4139_v20 = vld [vmem:[#allocation29] sm:$0xff]   ;;  %v4144_v39 = vld [vmem:[#allocation11 + $0x8] sm:$0xff]  }
 0x163   : > { %s5346_s2 = scalar_select %p1285_p13, %s4864_s26, 1  ;;  %3653 = vmatprep.subr.bf16.mxu0 %v4927_v15  ;;  %3661 = vmatprep.subr.bf16.mxu1 %v4927_v15  ;;  %v4138_v18 = vld [vmem:[#allocation29 + $0x8] sm:$0xff]   ;;  %v4145_v42 = vld [vmem:[#allocation11] sm:$0xff]   ;;  %v3515_v45 = vld [vmem:[#allocation27] ss:$0 sm:$0xff]  ;;  %vm1436_vm2 = vcmask 257024  }
 0x164   : > { %s5729_s17 = sld [smem:[#allocation56_spill]]  ;;  %3654 = vmatpush3.bf16.msra.mxu0 %v4136_v14  ;;  %3657 = vmatprep.mubr.msk.bf16.mxu0 %vm4928_vm1, %v4927_v15  ;;  %v4141_v22 = vld [vmem:[#allocation15 + $0x8] sm:$0xff]   ;;  %v4143_v24 = vld [vmem:[#allocation15] sm:$0xff]   ;;  %v3523_v59 = vld [vmem:[#allocation14] ss:$0 sm:$0xff]  ;;  %vm1815_vm3 = vcmask 1043456  }
 0x165   : > { %s5349_s28 = sshll.u32 %s5346_s2, 3  ;;  %3655 = vmatprep.subr.bf16.mxu0 %v4927_v15  ;;  %s5730_s25 = sld [smem:[#allocation60_spill]]  ;;  %3662 = vmatpush3.bf16.msra.mxu1 %v4138_v18  ;;  %v3587_v32 = vld [vmem:[#allocation6] ss:$0 sm:$0xff]  ;;  %v3588_v34 = vld [vmem:[#allocation9] ss:$0 sm:$0xff] }
 0x166   : > { %3663 = vmatprep.subr.bf16.mxu1 %v4927_v15  ;;  %3665 = vmatprep.mubr.msk.bf16.mxu1 %vm4928_vm1, %v4927_v15  ;;  %v3519_v51 = vld [vmem:[#allocation30] ss:$0 sm:$0xff]  ;;  %v3527_v60 = vld [vmem:[#allocation17] ss:$0 sm:$0xff]  ;;  %vm1754_vm4 = vcmask 64512   ;;  %s4929_s6 = smov 120  }
 0x167   : > { %s1295_s16 = scalar_lea.vmem %s5727_s22, %s5349_s28  ;;  %s4930_s7 = smov 104   ;;  %vm2215_vm6 = vcmask 130048   ;;  %vm2217_vm7 = vcmask 195584   ;;  %vm3023_vm8 = vcmask 523264  }
 0x168   : > { %s1291_s0 = scalar_lea.vmem %s5728_s11, %s5349_s28  ;;  %v1498_v0 = vld [vmem:[%s1295_s16] sm:$0xff]  ;;  %3656 = vmatpush3.bf16.msra.mxu0 %v4137_v17  ;;  %s4931_s10 = smov 112  }
 0x169   : > { %v1499_v1 = vsel %vm1391_vm0, %v1498_v0, 0.0  ;;  %v5356_v2 = vld [vmem:[%s1291_s0] sm:$0xff]  ;;  %3669 = vmatprep.subr.bf16.mxu0 %v4927_v15  ;;  %3664 = vmatpush3.bf16.msra.mxu1 %v4139_v20  ;;  %s4933_s18 = smov 8   ;;  %s4934_s3 = smov 16  }
 0x16a   : > { %1500 = vadd.xlane.f32.xlu0 %v1499_v1  ;;  %v1652_v3 = vsel %vm1391_vm0, %v5356_v2, 0.0  ;;  %s1299_s5 = scalar_lea.vmem %s5729_s17, %s5349_s28  ;;  %3677 = vmatprep.subr.bf16.mxu1 %v4927_v15  ;;  %s4935_s4 = smov 24  }
 0x16b   : > { %v1371_v16 = vld [vmem:[%s1299_s5] sm:$0xff]  ;;  %v4140_v21 = vld [vmem:[%s5730_s25 + $0x8] sm:$0xff]   ;;  %s5731_s22 = sld [smem:[#allocation63_spill]]  ;;  %p5736_p9 = scmp.ne.s32.totalorder %s5705_s15, 0 }
 0x16c   : > { %v1372_v19 = vpack.c.bf16 %v1371_v16, %v1371_v16  ;;  %v4142_v23 = vld [vmem:[%s5730_s25] sm:$0xff]   ;;  %s5733_s28 = sld [smem:[#allocation57_spill]] }
 0x16d   : > { %s5734_s17 = sld [smem:[#allocation70_spill]] }
 0x16e   : > { %1653 = vadd.xlane.f32.xlu0 %v1652_v3  ;;  %3658 = vmatmul.mubr.msk.bf16.vlgmr.msra.gmra.mxu0 %vm1391_vm0, %v1372_v19 }
 0x16f   : > { %3673 = vmatprep.mubr.msk.bf16.mxu0 %vm4928_vm1, %v4927_v15  ;;  %3666 = vmatmul.mubr.msk.bf16.vlgmr.msra.gmra.mxu1 %vm1391_vm0, %v1372_v19 }
 0x170   : > { %3670 = vmatpush3.bf16.msra.mxu0 %v4140_v21  ;;  %3678 = vmatpush3.bf16.msra.mxu1 %v4141_v22 }
 0x171   : > { %3671 = vmatprep.subr.bf16.mxu0 %v4927_v15  ;;  %3679 = vmatprep.subr.bf16.mxu1 %v4927_v15  ;;  %s5732_s11 = smov %s5731_s22 }
 0x172   : > { %3681 = vmatprep.mubr.msk.bf16.mxu1 %vm4928_vm1, %v4927_v15  ;;  %s1302_s16 = scalar_lea.vmem %s5733_s28, %s5346_s2  ;;  %s5569_s2 = sand.u32 1, %s4856_s23  }
 0x173   : > { %s3510_s0 = sshll.u32 %s5569_s2, 3 }
 0x174   : > { %3672 = vmatpush3.bf16.msra.mxu0 %v4142_v23  ;;  %3680 = vmatpush3.bf16.msra.mxu1 %v4143_v24  ;;  %s5577_s5 = scalar_lea.vmem [#allocation39], %s3510_s0 }
 0x175   : > { %3685 = vmatprep.subr.bf16.mxu0 %v4927_v15  ;;  %3693 = vmatprep.subr.bf16.mxu1 %v4927_v15 }
 0x1f3   : > { %v1501_v4 = vpop.xlane.xlu0 %1500 }
 0x1f4   : > { %v1503_v5 = vmul.f32 0.03125, %v1501_v4 }
 0x1f6   : > { %v1504_v6 = vsub.f32 %v1498_v0, %v1503_v5 }
 0x1f7   : > { %v1654_v7 = vpop.xlane.xlu0 %1653 }
 0x1f8   : > { %v1656_v8 = vmul.f32 0.03125, %v1654_v7  ;;  %v1505_v9 = vmul.f32 %v1504_v6, %v1504_v6 }
 0x1fa   : > { %v1657_v10 = vsub.f32 %v5356_v2, %v1656_v8  ;;  %v1506_v11 = vsel %vm1391_vm0, %v1505_v9, 0.0 }
 0x1fb   : > { %1507 = vadd.xlane.f32.xlu1 %v1506_v11 }
 0x1fc   : > { %v1658_v12 = vmul.f32 %v1657_v10, %v1657_v10 }
 0x1fe   : > { %v1659_v13 = vsel %vm1391_vm0, %v1658_v12, 0.0 }
 0x1ff   : > { %1660 = vadd.xlane.f32.xlu1 %v1659_v13 }
 0x22e   : > { %v1429_v46 = vpop.f32.mrf.mxu0 }
 0x22f   : > { %v1430_v47 = vadd.f32 %v3515_v45, %v1429_v46  ;;  %v1490_v53 = vpop.f32.mrf.mxu1 }
 0x230   : > { %v3659_v48 = vpop.f32.mrf.mxu0  ;;  %v1491_v54 = vadd.f32 %v3519_v51, %v1490_v53 }
 0x231   : > { %v1435_v49 = vpack.c.bf16 %v1430_v47, %v1430_v47  ;;  %v3667_v55 = vpop.f32.mrf.mxu1 }
 0x232   : > { %v1432_v50 = vpop.f32.mrf.mxu0  ;;  %v1496_v56 = vpack.c.bf16 %v1491_v54, %v1491_v54 }
 0x233   : > { %1437 = vst.msk [vmem:[#allocation4] sm:$0xf] %vm1436_vm2, %v1435_v49  ;;  %v1493_v57 = vpop.f32.mrf.mxu1 }
 0x234   : > { %v3660_v52 = vpop.f32.mrf.mxu0  ;;  %1497 = vst.msk [vmem:[#allocation5] sm:$0xf] %vm1436_vm2, %v1496_v56 }
 0x235   : > { %v3668_v58 = vpop.f32.mrf.mxu1 }
 0x284   : > { %v1508_v25 = vpop.xlane.xlu1 %1507 }
 0x285   : > { %v1509_v26 = vmul.f32 0.03125, %v1508_v25 }
 0x287   : > { %v1510_v27 = vadd.f32 1e-06, %v1509_v26 }
 0x288   : > { %v1661_v28 = vpop.xlane.xlu1 %1660 }
 0x289   : > { %4162 = vrsqrt.f32 %v1510_v27  ;;  %v1662_v29 = vmul.f32 0.03125, %v1661_v28 }
 0x28b   : > { %v1663_v30 = vadd.f32 1e-06, %v1662_v29 }
 0x28d   : > { %4164 = vrsqrt.f32 %v1663_v30 }
 0x296   : > { %v4163_v31 = vpop.eup %4162 }
 0x297   : > { %v1512_v33 = vmul.f32 %v4163_v31, %v1504_v6 }
 0x299   : > { %v1519_v35 = vmul.f32 %v3587_v32, %v1512_v33  ;;  %v1514_v33 = vlaneseq }
 0x29a   : > { %v4165_v36 = vpop.eup %4164 }
 0x29b   : > { %v1665_v37 = vmul.f32 %v4165_v36, %v1657_v10  ;;  %v1526_v38 = vadd.f32 %v3588_v34, %v1519_v35  ;;  %v3531_v10 = vld [vmem:[#allocation12] ss:$0 sm:$0xff]  ;;  %v1686_v35 = vand.u32 127, %v1514_v33  ;;  %v4932_v36 = vmov -inf  }
 0x29d   : > { %v1527_v40 = vpack.c.bf16 %v1526_v38, %v1526_v38  ;;  %v1672_v41 = vmul.f32 %v3587_v32, %v1665_v37 }
 0x29f   : > { %3674 = vmatmul.mubr.msk.bf16.vlgmr.msra.gmra.mxu0 %vm1391_vm0, %v1527_v40  ;;  %3682 = vmatmul.mubr.msk.bf16.vlgmr.msra.gmra.mxu1 %vm1391_vm0, %v1527_v40  ;;  %v1679_v43 = vadd.f32 %v3588_v34, %v1672_v41  ;;  %v5433_v34 = vshrl.u32 %v1514_v33, 7 }
 0x2a0   : > { %3686 = vmatpush3.bf16.msra.mxu0 %v4144_v39  ;;  %3689 = vmatprep.mubr.msk.bf16.mxu0 %vm4928_vm1, %v4927_v15 }
 0x2a1   : > { %3687 = vmatprep.subr.bf16.mxu0 %v4927_v15  ;;  %3695 = vmatprep.mubr.msk.bf16.mxu1 %vm4928_vm1, %v4927_v15  ;;  %v1689_v44 = vpack.c.bf16 %v1679_v43, %v1679_v43  ;;  %vm1687_vm5 = vcmp.le.s32.totalorder %v1686_v35, %v5433_v34 }
 0x2a2   : > { %v1688_v37 = vsel %vm1687_vm5, 0.0, %v4932_v36 }
 0x2a4   : > { %3688 = vmatpush3.bf16.msra.mxu0 %v4145_v42 }
 0x2a5   : > { %3699 = vmatprep.subr.bf16.mxu0 %v4927_v15 }
 0x2a7   : > { %3690 = vmatmul.mubr.msk.bf16.vlgmr.msra.gmra.mxu0 %vm1391_vm0, %v1689_v44 }
 0x2a8   : > { %3701 = vmatprep.mubr.msk.bf16.mxu0 %vm4928_vm1, %v4927_v15 }
 0x35f   : > { %v1583_v61 = vpop.f32.mrf.mxu0  ;;  %v1643_v62 = vpop.f32.mrf.mxu1 }
 0x360   : > { %v1584_v63 = vadd.f32 %v3523_v59, %v1583_v61  ;;  %v1644_v0 = vadd.f32 %v3527_v60, %v1643_v62 }
 0x361   : > { %v3675_v1 = vpop.f32.mrf.mxu0  ;;  %v3683_v3 = vpop.f32.mrf.mxu1 }
 0x362   : > { %v1589_v4 = vpack.c.bf16 %v1584_v63, %v1584_v63  ;;  %v1649_v5 = vpack.c.bf16 %v1644_v0, %v1644_v0 }
 0x363   : > { %v1586_v6 = vpop.f32.mrf.mxu0  ;;  %v1646_v7 = vpop.f32.mrf.mxu1 }
 0x364   : > { %1590 = vst.msk [vmem:[#allocation2] sm:$0xf] %vm1436_vm2, %v1589_v4  ;;  %1650 = vst.msk [vmem:[#allocation3] sm:$0xf] %vm1436_vm2, %v1649_v5 }
 0x365   : > { %v3676_v8 = vpop.f32.mrf.mxu0  ;;  %v3684_v9 = vpop.f32.mrf.mxu1 }
 0x367   : > { %v1745_v11 = vpop.f32.mrf.mxu0 }
 0x368   : > { %v1746_v12 = vadd.f32 %v3531_v10, %v1745_v11 }
 0x369   : > { %v3691_v13 = vpop.f32.mrf.mxu0 }
 0x36a   : > { %v1751_v14 = vmul.f32 0.35355338, %v1746_v12 }
 0x36b   : > { %v1748_v16 = vpop.f32.mrf.mxu0  ;;  %v1753_v17 = vld [vmem:[#allocation2] sm:$0xf]  ;;  %v5402_v18 = vld [vmem:[#allocation3] sm:$0xf] }
 0x36c   : > { %v1752_v19 = vpack.c.bf16 %v1751_v14, %v1751_v14  ;;  %v1759_v20 = vsel %vm1754_vm4, %v1753_v17, 0  ;;  %v1817_v21 = vsel %vm1815_vm3, %v5402_v18, 0  ;;  %v3537_v22 = vcombine.low %v1753_v17, %v1753_v17 }
 0x36d   : > { %v3692_v23 = vpop.f32.mrf.mxu0  ;;  %3694 = vmatpush3.bf16.xpose.msra.mxu1 %v1759_v20  ;;  %3700 = vmatpush3.bf16.msra.mxu0 %v1817_v21  ;;  %v3539_v60 = vcombine.low %v5402_v18, %v5402_v18 }
 0x36e   : > { %1868 = vrot.lane.b32.xlu0 %v3537_v22, %s4929_s6  ;;  %1863 = vrot.lane.b32.xlu1 %v1752_v19, %s4929_s6 }
 0x36f   : > { %3705 = vmatprep.subr.bf16.mxu1 %v4927_v15  ;;  %3711 = vmatprep.subr.bf16.mxu0 %v4927_v15 }
 0x372   : > { %2093 = vrot.lane.b32.xlu0 %v3537_v22, %s4930_s7  ;;  %1982 = vrot.lane.b32.xlu1 %v3537_v22, %s4931_s10 }
 0x374   : > { %3696 = vmatmul.mubr.msk.bf16.vlgmr.msra.gmra.mxu1 %vm1754_vm4, %v1752_v19 }
 0x375   : > { %3707 = vmatprep.mubr.msk.bf16.mxu1 %vm4928_vm1, %v4927_v15 }
 0x376   : > { %1980 = vrot.lane.b32.xlu1 %v1752_v19, %s4931_s10 }
 0x37a   : > { %2091 = vrot.lane.b32.xlu1 %v1752_v19, %s4930_s7 }
 0x3e0   : > { %v1864_v24 = vpop.permute.xlu1 %1863  ;;  %v1869_v25 = vpop.permute.xlu0 %1868 }
 0x3e1   : > { %v1874_v26 = vsel %vm1754_vm4, %v1869_v25, 0 }
 0x3e2   : > { %3706 = vmatpush3.bf16.xpose.msra.mxu1 %v1874_v26 }
 0x3e3   : > { %3717 = vmatprep.subr.bf16.mxu1 %v4927_v15 }
 0x3e4   : > { %v1983_v27 = vpop.permute.xlu1 %1982  ;;  %v2094_v29 = vpop.permute.xlu0 %2093 }
 0x3e5   : > { %v1988_v28 = vsel %vm1754_vm4, %v1983_v27, 0  ;;  %v2099_v31 = vsel %vm1754_vm4, %v2094_v29, 0 }
 0x3e8   : > { %v1981_v30 = vpop.permute.xlu1 %1980 }
 0x3e9   : > { %3708 = vmatmul.mubr.msk.bf16.vlgmr.msra.gmra.mxu1 %vm1754_vm4, %v1864_v24 }
 0x3ea   : > { %3718 = vmatpush3.bf16.xpose.msra.mxu1 %v1988_v28  ;;  %3719 = vmatprep.mubr.msk.bf16.mxu1 %vm4928_vm1, %v4927_v15 }
 0x3eb   : > { %3729 = vmatprep.subr.bf16.mxu1 %v4927_v15 }
 0x3ec   : > { %v2092_v32 = vpop.permute.xlu1 %2091 }
 0x3f1   : > { %3720 = vmatmul.mubr.msk.bf16.vlgmr.msra.gmra.mxu1 %vm1754_vm4, %v1981_v30 }
 0x3f2   : > { %3730 = vmatpush3.bf16.xpose.msra.mxu1 %v2099_v31  ;;  %3731 = vmatprep.mubr.msk.bf16.mxu1 %vm4928_vm1, %v4927_v15 }
 0x3f3   : > { %3741 = vmatprep.subr.bf16.mxu1 %v4927_v15 }
 0x3f9   : > { %3732 = vmatmul.mubr.msk.bf16.vlgmr.msra.gmra.mxu1 %vm1754_vm4, %v2092_v32 }
 0x3fa   : > { %3745 = vmatprep.mubr.msk.bf16.mxu1 %vm4928_vm1, %v4927_v15 }
 0x434   : > { %v1795_v38 = vpop.f32.mrf.mxu1 }
 0x435   : > { %v1796_v39 = vadd.f32 %v1795_v38, %v1688_v37  ;;  %v4148_v38 = vld [vmem:[#allocation18 + $0x8] sm:$0xff]  }
 0x436   : > { %v3697_v40 = vpop.f32.mrf.mxu1  ;;  %3742 = vmatpush3.bf16.msra.mxu1 %v4148_v38 }
 0x437   : > { %v1801_v41 = vsel %vm1754_vm4, %v1796_v39, -inf  ;;  %3743 = vmatprep.subr.bf16.mxu1 %v4927_v15 }
 0x438   : > { %1802 = vmax.xlane.f32.xlu0 %v1801_v41  ;;  %v1798_v42 = vpop.f32.mrf.mxu1 }
 0x439   : > { %v4149_v42 = vld [vmem:[#allocation18] sm:$0xff]  }
 0x43a   : > { %v3698_v43 = vpop.f32.mrf.mxu1  ;;  %3744 = vmatpush3.bf16.msra.mxu1 %v4149_v42 }
 0x43b   : > { %3757 = vmatprep.subr.bf16.mxu1 %v4927_v15 }
 0x4a9   : > { %v1910_v44 = vpop.f32.mrf.mxu1 }
 0x4aa   : > { %v1911_v45 = vadd.f32 %v1910_v44, %v1688_v37 }
 0x4ab   : > { %v3709_v46 = vpop.f32.mrf.mxu1 }
 0x4ac   : > { %v1916_v47 = vsel %vm1754_vm4, %v1911_v45, -inf }
 0x4ad   : > { %1917 = vmax.xlane.f32.xlu1 %v1916_v47  ;;  %v1913_v48 = vpop.f32.mrf.mxu1 }
 0x4af   : > { %v3710_v49 = vpop.f32.mrf.mxu1 }
 0x4b1   : > { %v2024_v50 = vpop.f32.mrf.mxu1 }
 0x4b2   : > { %v2025_v51 = vadd.f32 %v2024_v50, %v1688_v37 }
 0x4b3   : > { %v3721_v52 = vpop.f32.mrf.mxu1 }
 0x4b4   : > { %v2030_v53 = vsel %vm1754_vm4, %v2025_v51, -inf }
 0x4b5   : > { %2031 = vmax.xlane.f32.xlu0 %v2030_v53  ;;  %v2027_v54 = vpop.f32.mrf.mxu1 }
 0x4b7   : > { %v3722_v55 = vpop.f32.mrf.mxu1 }
 0x4b9   : > { %v2135_v56 = vpop.f32.mrf.mxu1 }
 0x4ba   : > { %v2136_v57 = vadd.f32 %v2135_v56, %v1688_v37 }
 0x4bb   : > { %v3733_v58 = vpop.f32.mrf.mxu1 }
 0x4bc   : > { %v2141_v59 = vsel %vm1754_vm4, %v2136_v57, -inf }
 0x4bd   : > { %2142 = vmax.xlane.f32.xlu0 %v2141_v59  ;;  %v2138_v61 = vpop.f32.mrf.mxu1 }
 0x4be   : > { %2040 = vrot.lane.b32.xlu1 %v3539_v60, %s4931_s10 }
 0x4bf   : > { %v3734_v62 = vpop.f32.mrf.mxu1 }
 0x4c1   : > { %v1803_v63 = vpop.xlane.xlu0 %1802 }
 0x4c2   : > { %v1804_v0 = vsub.f32 %v1796_v39, %v1803_v63  ;;  %2151 = vrot.lane.b32.xlu1 %v3539_v60, %s4930_s7 }
 0x4c4   : > { %v1805_v1 = vmul.f32 1.442695, %v1804_v0 }
 0x4c6   : > { %4166 = vpow2.f32 %v1805_v1 }
 0x4d3   : > { %v4167_v3 = vpop.eup %4166  ;;  %1929 = vrot.lane.b32.xlu0 %v3539_v60, %s4929_s6 }
 0x4d4   : > { %v1810_v4 = vpack.c.bf16 %v4167_v3, %v4167_v3  ;;  %v1807_v29 = vsel %vm1754_vm4, %v4167_v3, 0.0 }
 0x4d6   : > { %3702 = vmatmul.mubr.msk.bf16.vlgmr.msra.gmra.mxu0 %vm1754_vm4, %v1810_v4 }
 0x4d7   : > { %3713 = vmatprep.mubr.msk.bf16.mxu0 %vm4928_vm1, %v4927_v15 }
 0x536   : > { %v1918_v5 = vpop.xlane.xlu1 %1917 }
 0x537   : > { %v1919_v6 = vsub.f32 %v1911_v45, %v1918_v5  ;;  %v2373_v5 = vld [vmem:[#allocation4] sm:$0xf] }
 0x539   : > { %v1920_v7 = vmul.f32 1.442695, %v1919_v6 }
 0x53a   : > { %v2041_v19 = vpop.permute.xlu1 %2040 }
 0x53b   : > { %4168 = vpow2.f32 %v1920_v7  ;;  %v2046_v21 = vsel %vm1815_vm3, %v2041_v19, 0  ;;  %v2382_v7 = vsel %vm1754_vm4, %v2373_v5, 0 }
 0x53e   : > { %v2032_v8 = vpop.xlane.xlu0 %2031  ;;  %v2152_v24 = vpop.permute.xlu1 %2151 }
 0x53f   : > { %v2033_v9 = vsub.f32 %v2025_v51, %v2032_v8  ;;  %v2157_v26 = vsel %vm1815_vm3, %v2152_v24, 0  ;;  %v3545_v8 = vld [vmem:[#allocation20] ss:$0 sm:$0xff] }
 0x541   : > { %v2034_v10 = vmul.f32 1.442695, %v2033_v9 }
 0x543   : > { %4170 = vpow2.f32 %v2034_v10 }
 0x546   : > { %v2143_v11 = vpop.xlane.xlu0 %2142 }
 0x547   : > { %v2144_v12 = vsub.f32 %v2136_v57, %v2143_v11 }
 0x548   : > { %v4169_v13 = vpop.eup %4168 }
 0x549   : > { %v2145_v14 = vmul.f32 1.442695, %v2144_v12  ;;  %v1922_v16 = vsel %vm1754_vm4, %v4169_v13, 0.0  ;;  %v1925_v20 = vpack.c.bf16 %v4169_v13, %v4169_v13 }
 0x54a   : > { %1923 = vadd.xlane.f32.xlu1 %v1922_v16  ;;  %v1930_v17 = vpop.permute.xlu0 %1929 }
 0x54b   : > { %4172 = vpow2.f32 %v2145_v14  ;;  %v1935_v18 = vsel %vm1815_vm3, %v1930_v17, 0 }
 0x54c   : > { %3712 = vmatpush3.bf16.msra.mxu0 %v1935_v18 }
 0x54d   : > { %3723 = vmatprep.subr.bf16.mxu0 %v4927_v15 }
 0x54f   : > { %3714 = vmatmul.mubr.msk.bf16.vlgmr.msra.gmra.mxu0 %vm1754_vm4, %v1925_v20 }
 0x550   : > { %v4171_v22 = vpop.eup %4170  ;;  %3724 = vmatpush3.bf16.msra.mxu0 %v2046_v21  ;;  %3725 = vmatprep.mubr.msk.bf16.mxu0 %vm4928_vm1, %v4927_v15 }
 0x551   : > { %v2036_v23 = vsel %vm1754_vm4, %v4171_v22, 0.0  ;;  %3735 = vmatprep.subr.bf16.mxu0 %v4927_v15  ;;  %v2039_v25 = vpack.c.bf16 %v4171_v22, %v4171_v22  ;;  %v3557_v22 = vcombine.low %v2373_v5, %v2373_v5 }
 0x552   : > { %2037 = vadd.xlane.f32.xlu0 %v2036_v23  ;;  %v4152_v23 = vld [vmem:[%s5732_s11] sm:$0xff]  }
 0x557   : > { %3726 = vmatmul.mubr.msk.bf16.vlgmr.msra.gmra.mxu0 %vm1754_vm4, %v2039_v25 }
 0x558   : > { %v4173_v27 = vpop.eup %4172  ;;  %3736 = vmatpush3.bf16.msra.mxu0 %v2157_v26  ;;  %3737 = vmatprep.mubr.msk.bf16.mxu0 %vm4928_vm1, %v4927_v15 }
 0x559   : > { %v2147_v28 = vsel %vm1754_vm4, %v4173_v27, 0.0  ;;  %3749 = vmatprep.subr.bf16.mxu0 %v4927_v15  ;;  %v2150_v30 = vpack.c.bf16 %v4173_v27, %v4173_v27 }
 0x55a   : > { %2148 = vadd.xlane.f32.xlu0 %v2147_v28  ;;  %v3549_v28 = vld [vmem:[#allocation21] ss:$0 sm:$0xff] }
 0x55e   : > { %1808 = vadd.xlane.f32.xlu0 %v1807_v29 }
 0x55f   : > { %3738 = vmatmul.mubr.msk.bf16.vlgmr.msra.gmra.mxu0 %vm1754_vm4, %v2150_v30  ;;  %v3550_v30 = vld [vmem:[#allocation23] ss:$0 sm:$0xff] }
 0x560   : > { %3753 = vmatprep.mubr.msk.bf16.mxu0 %vm4928_vm1, %v4927_v15 }
 0x596   : > { %v1853_v31 = vpop.f32.mrf.mxu0 }
 0x598   : > { %v3703_v32 = vpop.f32.mrf.mxu0 }
 0x59a   : > { %v1856_v33 = vpop.f32.mrf.mxu0 }
 0x59b   : > { %v5493_v33 = vld [vmem:[#allocation5] sm:$0xf] }
 0x59c   : > { %v3704_v35 = vpop.f32.mrf.mxu0 }
 0x5d3   : > { %v1924_v36 = vpop.xlane.xlu1 %1923 }
 0x5d4   : > { %4174 = vrcp.f32 %v1924_v36  ;;  %v2439_v36 = vsel %vm1815_vm3, %v5493_v33, 0 }
 0x5db   : > { %v2038_v37 = vpop.xlane.xlu0 %2037 }
 0x5dc   : > { %4176 = vrcp.f32 %v2038_v37  ;;  %v3551_v37 = vld [vmem:[#allocation24] ss:$0 sm:$0xff] }
 0x5e1   : > { %v4175_v39 = vpop.eup %4174 }
 0x5e3   : > { %v2149_v40 = vpop.xlane.xlu0 %2148 }
 0x5e4   : > { %4178 = vrcp.f32 %v2149_v40 }
 0x5e7   : > { %v1809_v59 = vpop.xlane.xlu0 %1808 }
 0x5e8   : > { %4180 = vrcp.f32 %v1809_v59 }
 0x5e9   : > { %v4177_v47 = vpop.eup %4176 }
 0x5f1   : > { %v4179_v53 = vpop.eup %4178 }
 0x5f5   : > { %v4181_v60 = vpop.eup %4180 }
 0x5f6   : > { %v1861_v62 = vmul.f32 %v4181_v60, %v1853_v31 }
 0x60f   : > { %v1971_v41 = vpop.f32.mrf.mxu0 }
 0x610   : > { %v1979_v43 = vmul.f32 %v4175_v39, %v1971_v41 }
 0x611   : > { %v3715_v44 = vpop.f32.mrf.mxu0 }
 0x612   : > { %2203 = vrot.lane.b32.xlu1 %v1979_v43, %s4933_s18 }
 0x613   : > { %v1974_v45 = vpop.f32.mrf.mxu0 }
 0x615   : > { %v3716_v46 = vpop.f32.mrf.mxu0 }
 0x616   : > { %v1305_v46 = vld [vmem:[%s1302_s16] sm:$0x1] }
 0x617   : > { %v2082_v48 = vpop.f32.mrf.mxu0 }
 0x618   : > { %v2090_v49 = vmul.f32 %v4177_v47, %v2082_v48  ;;  %v1306_v48 = vunpack.c.l.bf16 %v1305_v46 }
 0x619   : > { %v3727_v50 = vpop.f32.mrf.mxu0 }
 0x61a   : > { %2207 = vrot.lane.b32.xlu0 %v2090_v49, %s4934_s3  ;;  %v1516_v49 = vsub.s32 0, %v5433_v34 }
 0x61b   : > { %v2085_v51 = vpop.f32.mrf.mxu0 }
 0x61c   : > { %v2377_v50 = vrot.slane %v1306_v48, %v1516_v49 }
 0x61d   : > { %v3728_v52 = vpop.f32.mrf.mxu0 }
 0x61f   : > { %v2193_v54 = vpop.f32.mrf.mxu0 }
 0x620   : > { %v2201_v55 = vmul.f32 %v4179_v53, %v2193_v54 }
 0x621   : > { %v3739_v56 = vpop.f32.mrf.mxu0 }
 0x622   : > { %2211 = vrot.lane.b32.xlu1 %v2201_v55, %s4935_s4 }
 0x623   : > { %v2196_v57 = vpop.f32.mrf.mxu0 }
 0x625   : > { %v3740_v58 = vpop.f32.mrf.mxu0 }
 0x684   : > { %v2204_v61 = vpop.permute.xlu1 %2203 }
 0x685   : > { %v2214_v0 = vsel %vm1754_vm4, %v1861_v62, %v2204_v61 }
 0x68c   : > { %v2208_v63 = vpop.permute.xlu0 %2207 }
 0x68d   : > { %v2216_v1 = vsel %vm2215_vm6, %v2214_v0, %v2208_v63 }
 0x694   : > { %v2212_v3 = vpop.permute.xlu1 %2211 }
 0x695   : > { %v2218_v4 = vsel %vm2217_vm7, %v2216_v1, %v2212_v3 }
 0x696   : > { %v2219_v6 = vpack.c.bf16 %v2218_v4, %v2218_v4 }
 0x698   : > { %3746 = vmatmul.mubr.msk.bf16.vlgmr.msra.gmra.mxu1 %vm1391_vm0, %v2219_v6 }
 0x699   : > { %3758 = vmatpush3.bf16.xpose.msra.mxu1 %v2382_v7  ;;  %3759 = vmatprep.mubr.msk.bf16.mxu1 %vm4928_vm1, %v4927_v15 }
 0x69a   : > { %3769 = vmatprep.subr.bf16.mxu1 %v4927_v15 }
 0x758   : > { %v2275_v9 = vpop.f32.mrf.mxu1 }
 0x759   : > { %v2276_v10 = vadd.f32 %v3545_v8, %v2275_v9 }
 0x75a   : > { %v3747_v11 = vpop.f32.mrf.mxu1 }
 0x75b   : > { %v5481_v12 = vadd.f32 %v2276_v10, %v5356_v2  ;;  %v4151_v2 = vld [vmem:[%s5731_s22 + $0x8] sm:$0xff]   ;;  %s4936_s22 = smov [#allocation39]  }
 0x75c   : > { %v2278_v13 = vpop.f32.mrf.mxu1  ;;  %3750 = vmatpush3.bf16.msra.mxu0 %v4151_v2  ;;  %s4726_s28 = sshll.u32 %s4936_s22, 4  ;;  %s4727_s28 = int_to_ptr.vmem [resolvable:$false] %s4726_s28 }
 0x75d   : > { %v2282_v14 = vsel %vm1391_vm0, %v5481_v12, 0.0  ;;  %3751 = vmatprep.subr.bf16.mxu0 %v4927_v15  ;;  %v3559_v13 = vcombine.low %v5493_v33, %v5493_v33  ;;  %s4728_s16 = scalar_lea.vmem %s4727_s28, 256 }
 0x75e   : > { %2283 = vadd.xlane.f32.xlu1 %v2282_v14  ;;  %v3748_v16 = vpop.f32.mrf.mxu1 }
 0x760   : > { %3752 = vmatpush3.bf16.msra.mxu0 %v4152_v23 }
 0x761   : > { %3763 = vmatprep.subr.bf16.mxu0 %v4927_v15 }
 0x7e7   : > { %v2284_v17 = vpop.xlane.xlu1 %2283 }
 0x7e8   : > { %v2285_v18 = vmul.f32 0.03125, %v2284_v17 }
 0x7ea   : > { %v2286_v19 = vsub.f32 %v5481_v12, %v2285_v18 }
 0x7ec   : > { %v2287_v20 = vmul.f32 %v2286_v19, %v2286_v19 }
 0x7ee   : > { %v2288_v21 = vsel %vm1391_vm0, %v2287_v20, 0.0 }
 0x7ef   : > { %2289 = vadd.xlane.f32.xlu0 %v2288_v21 }
 0x805   : > { %2490 = vrot.lane.b32.xlu0 %v3557_v22, %s4929_s6 }
 0x809   : > { %2715 = vrot.lane.b32.xlu0 %v3557_v22, %s4930_s7 }
 0x878   : > { %v2290_v24 = vpop.xlane.xlu0 %2289 }
 0x879   : > { %v2291_v25 = vmul.f32 0.03125, %v2290_v24 }
 0x87b   : > { %v2292_v26 = vadd.f32 1e-06, %v2291_v25 }
 0x87c   : > { %v2491_v42 = vpop.permute.xlu0 %2490 }
 0x87d   : > { %4182 = vrsqrt.f32 %v2292_v26  ;;  %v2496_v47 = vsel %vm1754_vm4, %v2491_v42, 0 }
 0x880   : > { %v2716_v34 = vpop.permute.xlu0 %2715 }
 0x881   : > { %v2721_v55 = vsel %vm1754_vm4, %v2716_v34, 0 }
 0x88a   : > { %v4183_v27 = vpop.eup %4182 }
 0x88b   : > { %v2294_v29 = vmul.f32 %v4183_v27, %v2286_v19 }
 0x88d   : > { %v2301_v31 = vmul.f32 %v3549_v28, %v2294_v29 }
 0x88f   : > { %v2308_v32 = vadd.f32 %v3550_v30, %v2301_v31 }
 0x891   : > { %v2309_v35 = vpack.c.bf16 %v2308_v32, %v2308_v32 }
 0x893   : > { %3754 = vmatmul.mubr.msk.bf16.vlgmr.msra.gmra.mxu0 %vm1391_vm0, %v2309_v35 }
 0x894   : > { %3764 = vmatpush3.bf16.msra.mxu0 %v2439_v36  ;;  %3765 = vmatprep.mubr.msk.bf16.mxu0 %vm4928_vm1, %v4927_v15 }
 0x895   : > { %3775 = vmatprep.subr.bf16.mxu0 %v4927_v15 }
 0x953   : > { %v2365_v38 = vpop.f32.mrf.mxu0 }
 0x954   : > { %v2366_v39 = vadd.f32 %v3551_v37, %v2365_v38 }
 0x955   : > { %v3755_v40 = vpop.f32.mrf.mxu0 }
 0x956   : > { %v2371_v41 = vmul.f32 0.35355338, %v2366_v39 }
 0x957   : > { %v2368_v43 = vpop.f32.mrf.mxu0 }
 0x958   : > { %v2372_v44 = vpack.c.bf16 %v2371_v41, %v2371_v41 }
 0x959   : > { %v3756_v45 = vpop.f32.mrf.mxu0 }
 0x95a   : > { %2485 = vrot.lane.b32.xlu1 %v2372_v44, %s4929_s6  ;;  %3760 = vmatmul.mubr.msk.bf16.vlgmr.msra.gmra.mxu1 %vm1754_vm4, %v2372_v44 }
 0x95b   : > { %3770 = vmatpush3.bf16.xpose.msra.mxu1 %v2496_v47  ;;  %3771 = vmatprep.mubr.msk.bf16.mxu1 %vm4928_vm1, %v4927_v15 }
 0x95c   : > { %3781 = vmatprep.subr.bf16.mxu1 %v4927_v15 }
 0x95e   : > { %2604 = vrot.lane.b32.xlu1 %v3557_v22, %s4931_s10 }
 0x962   : > { %2602 = vrot.lane.b32.xlu1 %v2372_v44, %s4931_s10 }
 0x966   : > { %2713 = vrot.lane.b32.xlu1 %v2372_v44, %s4930_s7 }
 0x9cc   : > { %v2486_v51 = vpop.permute.xlu1 %2485 }
 0x9cd   : > { %3772 = vmatmul.mubr.msk.bf16.vlgmr.msra.gmra.mxu1 %vm1754_vm4, %v2486_v51 }
 0x9ce   : > { %3783 = vmatprep.mubr.msk.bf16.mxu1 %vm4928_vm1, %v4927_v15 }
 0x9d0   : > { %v2605_v52 = vpop.permute.xlu1 %2604 }
 0x9d1   : > { %v2610_v53 = vsel %vm1754_vm4, %v2605_v52, 0 }
 0x9d2   : > { %3782 = vmatpush3.bf16.xpose.msra.mxu1 %v2610_v53 }
 0x9d3   : > { %3793 = vmatprep.subr.bf16.mxu1 %v4927_v15 }
 0x9d4   : > { %v2603_v54 = vpop.permute.xlu1 %2602 }
 0x9d8   : > { %v2714_v56 = vpop.permute.xlu1 %2713 }
 0x9d9   : > { %3784 = vmatmul.mubr.msk.bf16.vlgmr.msra.gmra.mxu1 %vm1754_vm4, %v2603_v54 }
 0x9da   : > { %3794 = vmatpush3.bf16.xpose.msra.mxu1 %v2721_v55  ;;  %3795 = vmatprep.mubr.msk.bf16.mxu1 %vm4928_vm1, %v4927_v15 }
 0x9db   : > { %3805 = vmatprep.subr.bf16.mxu1 %v4927_v15 }
 0x9e1   : > { %3796 = vmatmul.mubr.msk.bf16.vlgmr.msra.gmra.mxu1 %vm1754_vm4, %v2714_v56  ;;  %v4154_v56 = vld [vmem:[#allocation32 + $0x8] sm:$0xff]  }
 0x9e2   : > { %3809 = vmatprep.mubr.msk.bf16.mxu1 %vm4928_vm1, %v4927_v15  ;;  %3806 = vmatpush3.bf16.msra.mxu1 %v4154_v56 }
 0x9e3   : > { %3807 = vmatprep.subr.bf16.mxu1 %v4927_v15 }
 0xa1a   : > { %v2418_v57 = vpop.f32.mrf.mxu1 }
 0xa1b   : > { %v2419_v58 = vadd.f32 %v2418_v57, %v2377_v50 }
 0xa1c   : > { %v3761_v59 = vpop.f32.mrf.mxu1 }
 0xa1d   : > { %v2424_v60 = vsel %vm1754_vm4, %v2419_v58, -inf }
 0xa1e   : > { %2425 = vmax.xlane.f32.xlu0 %v2424_v60  ;;  %v2421_v61 = vpop.f32.mrf.mxu1 }
 0xa20   : > { %v3762_v62 = vpop.f32.mrf.mxu1 }
 0xa8d   : > { %v2532_v63 = vpop.f32.mrf.mxu1 }
 0xa8e   : > { %v2533_v0 = vadd.f32 %v2532_v63, %v2377_v50  ;;  %v4155_v63 = vld [vmem:[#allocation32] sm:$0xff]  }
 0xa8f   : > { %v3773_v1 = vpop.f32.mrf.mxu1  ;;  %3808 = vmatpush3.bf16.msra.mxu1 %v4155_v63 }
 0xa90   : > { %v2538_v3 = vsel %vm1754_vm4, %v2533_v0, -inf  ;;  %3821 = vmatprep.subr.bf16.mxu1 %v4927_v15 }
 0xa91   : > { %2539 = vmax.xlane.f32.xlu1 %v2538_v3  ;;  %v2535_v4 = vpop.f32.mrf.mxu1 }
 0xa93   : > { %v3774_v5 = vpop.f32.mrf.mxu1 }
 0xa99   : > { %v2646_v6 = vpop.f32.mrf.mxu1 }
 0xa9a   : > { %v2647_v7 = vadd.f32 %v2646_v6, %v2377_v50 }
 0xa9b   : > { %v3785_v8 = vpop.f32.mrf.mxu1 }
 0xa9c   : > { %v2652_v9 = vsel %vm1754_vm4, %v2647_v7, -inf }
 0xa9d   : > { %2653 = vmax.xlane.f32.xlu0 %v2652_v9  ;;  %v2649_v10 = vpop.f32.mrf.mxu1 }
 0xa9f   : > { %v3786_v11 = vpop.f32.mrf.mxu1 }
 0xaa1   : > { %v2757_v14 = vpop.f32.mrf.mxu1 }
 0xaa2   : > { %v2758_v16 = vadd.f32 %v2757_v14, %v2377_v50  ;;  %2662 = vrot.lane.b32.xlu1 %v3559_v13, %s4931_s10 }
 0xaa3   : > { %v3797_v17 = vpop.f32.mrf.mxu1 }
 0xaa4   : > { %v2763_v18 = vsel %vm1754_vm4, %v2758_v16, -inf }
 0xaa5   : > { %2764 = vmax.xlane.f32.xlu0 %v2763_v18  ;;  %v2760_v19 = vpop.f32.mrf.mxu1 }
 0xaa6   : > { %2773 = vrot.lane.b32.xlu1 %v3559_v13, %s4930_s7  ;;  %s5680_s7 = sshll.u32 %s4864_s26, 7 }
 0xaa7   : > { %v2426_v20 = vpop.xlane.xlu0 %2425  ;;  %v3798_v21 = vpop.f32.mrf.mxu1  ;;  %s3102_s10 = scalar_lea.hbm %s5101_s20, %s5680_s7 }
 0xaa8   : > { %v2427_v22 = vsub.f32 %v2419_v58, %v2426_v20 }
 0xaaa   : > { %v2428_v2 = vmul.f32 1.442695, %v2427_v22 }
 0xaac   : > { %4184 = vpow2.f32 %v2428_v2 }
 0xab9   : > { %v4185_v23 = vpop.eup %4184 }
 0xaba   : > { %v2433_v24 = vpack.c.bf16 %v4185_v23, %v4185_v23  ;;  %v2430_v49 = vsel %vm1754_vm4, %v4185_v23, 0.0 }
 0xabb   : > { %2551 = vrot.lane.b32.xlu0 %v3559_v13, %s4929_s6  ;;  %s5735_s6 = sld [smem:[#allocation71_spill]] }
 0xabc   : > { %3766 = vmatmul.mubr.msk.bf16.vlgmr.msra.gmra.mxu0 %vm1754_vm4, %v2433_v24 }
 0xabd   : > { %3777 = vmatprep.mubr.msk.bf16.mxu0 %vm4928_vm1, %v4927_v15 }
 0xb1a   : > { %v2540_v25 = vpop.xlane.xlu1 %2539 }
 0xb1b   : > { %v2541_v26 = vsub.f32 %v2533_v0, %v2540_v25  ;;  %v3565_v25 = vld [vmem:[#allocation33] ss:$0 sm:$0xff] }
 0xb1d   : > { %v2542_v27 = vmul.f32 1.442695, %v2541_v26 }
 0xb1e   : > { %v2663_v39 = vpop.permute.xlu1 %2662 }
 0xb1f   : > { %4186 = vpow2.f32 %v2542_v27  ;;  %v2668_v41 = vsel %vm1815_vm3, %v2663_v39, 0  ;;  %v4157_v39 = vld [vmem:[%s5734_s17] sm:$0xff]  }
 0xb22   : > { %v2774_v44 = vpop.permute.xlu1 %2773 }
 0xb23   : > { %v2779_v46 = vsel %vm1815_vm3, %v2774_v44, 0 }
 0xb26   : > { %v2654_v28 = vpop.xlane.xlu0 %2653 }
 0xb27   : > { %v2655_v29 = vsub.f32 %v2647_v7, %v2654_v28 }
 0xb29   : > { %v2656_v30 = vmul.f32 1.442695, %v2655_v29 }
 0xb2b   : > { %4188 = vpow2.f32 %v2656_v30 }
 0xb2c   : > { %v4187_v31 = vpop.eup %4186 }
 0xb2d   : > { %v2544_v32 = vsel %vm1754_vm4, %v4187_v31, 0.0  ;;  %v2547_v40 = vpack.c.bf16 %v4187_v31, %v4187_v31 }
 0xb2e   : > { %2545 = vadd.xlane.f32.xlu1 %v2544_v32  ;;  %v2765_v33 = vpop.xlane.xlu0 %2764 }
 0xb2f   : > { %v2766_v35 = vsub.f32 %v2758_v16, %v2765_v33 }
 0xb31   : > { %v2767_v36 = vmul.f32 1.442695, %v2766_v35 }
 0xb32   : > { %v2552_v37 = vpop.permute.xlu0 %2551 }
 0xb33   : > { %4190 = vpow2.f32 %v2767_v36  ;;  %v2557_v38 = vsel %vm1815_vm3, %v2552_v37, 0 }
 0xb34   : > { %3776 = vmatpush3.bf16.msra.mxu0 %v2557_v38  ;;  %v4156_v38 = vld [vmem:[%s5734_s17 + $0x8] sm:$0xff]  }
 0xb35   : > { %3787 = vmatprep.subr.bf16.mxu0 %v4927_v15 }
 0xb37   : > { %3778 = vmatmul.mubr.msk.bf16.vlgmr.msra.gmra.mxu0 %vm1754_vm4, %v2547_v40  ;;  %v4158_v40 = vld [vmem:[%s5086_s27 + $0x18] sm:$0xff]  }
 0xb38   : > { %v4189_v42 = vpop.eup %4188  ;;  %3788 = vmatpush3.bf16.msra.mxu0 %v2668_v41  ;;  %3789 = vmatprep.mubr.msk.bf16.mxu0 %vm4928_vm1, %v4927_v15  ;;  %v4159_v41 = vld [vmem:[%s5086_s27 + $0x10] sm:$0xff]  }
 0xb39   : > { %v2658_v43 = vsel %vm1754_vm4, %v4189_v42, 0.0  ;;  %3799 = vmatprep.subr.bf16.mxu0 %v4927_v15  ;;  %v2661_v45 = vpack.c.bf16 %v4189_v42, %v4189_v42 }
 0xb3a   : > { %2659 = vadd.xlane.f32.xlu0 %v2658_v43 }
 0xb3f   : > { %3790 = vmatmul.mubr.msk.bf16.vlgmr.msra.gmra.mxu0 %vm1754_vm4, %v2661_v45 }
 0xb40   : > { %v4191_v47 = vpop.eup %4190  ;;  %3800 = vmatpush3.bf16.msra.mxu0 %v2779_v46  ;;  %3801 = vmatprep.mubr.msk.bf16.mxu0 %vm4928_vm1, %v4927_v15  ;;  %v3569_v46 = vld [vmem:[#allocation35] ss:$0 sm:$0xff] }
 0xb41   : > { %v2769_v48 = vsel %vm1754_vm4, %v4191_v47, 0.0  ;;  %3813 = vmatprep.subr.bf16.mxu0 %v4927_v15  ;;  %v2772_v50 = vpack.c.bf16 %v4191_v47, %v4191_v47 }
 0xb42   : > { %2770 = vadd.xlane.f32.xlu0 %v2769_v48  ;;  %v3570_v48 = vld [vmem:[#allocation36] ss:$0 sm:$0xff] }
 0xb46   : > { %2431 = vadd.xlane.f32.xlu0 %v2430_v49 }
 0xb47   : > { %3802 = vmatmul.mubr.msk.bf16.vlgmr.msra.gmra.mxu0 %vm1754_vm4, %v2772_v50 }
 0xb48   : > { %3817 = vmatprep.mubr.msk.bf16.mxu0 %vm4928_vm1, %v4927_v15  ;;  %3814 = vmatpush3.bf16.msra.mxu0 %v4156_v38 }
 0xb49   : > { %3815 = vmatprep.subr.bf16.mxu0 %v4927_v15 }
 0xb4c   : > { %3816 = vmatpush3.bf16.msra.mxu0 %v4157_v39 }
 0xb7c   : > { %v2475_v51 = vpop.f32.mrf.mxu0 }
 0xb7e   : > { %v3767_v52 = vpop.f32.mrf.mxu0 }
 0xb7f   : > { %v4160_v52 = vld [vmem:[%s5086_s27 + $0x8] sm:$0xff]  }
 0xb80   : > { %v2478_v53 = vpop.f32.mrf.mxu0 }
 0xb81   : > { %v4161_v53 = vld [vmem:[%s5086_s27] sm:$0xff]  }
 0xb82   : > { %v3768_v34 = vpop.f32.mrf.mxu0 }
 0xb83   : > { %v3571_v34 = vld [vmem:[%s5735_s6] ss:$0 sm:$0xff] }
 0xbb7   : > { %v2546_v54 = vpop.xlane.xlu1 %2545 }
 0xbb8   : > { %4192 = vrcp.f32 %v2546_v54 }
 0xbc3   : > { %v2660_v55 = vpop.xlane.xlu0 %2659 }
 0xbc4   : > { %4194 = vrcp.f32 %v2660_v55 }
 0xbc5   : > { %v4193_v57 = vpop.eup %4192 }
 0xbcb   : > { %v2771_v58 = vpop.xlane.xlu0 %2770 }
 0xbcc   : > { %4196 = vrcp.f32 %v2771_v58 }
 0xbcf   : > { %v2432_v16 = vpop.xlane.xlu0 %2431 }
 0xbd0   : > { %4198 = vrcp.f32 %v2432_v16 }
 0xbd1   : > { %v4195_v1 = vpop.eup %4194 }
 0xbd9   : > { %v4197_v8 = vpop.eup %4196 }
 0xbdd   : > { %v4199_v17 = vpop.eup %4198 }
 0xbde   : > { %v2483_v19 = vmul.f32 %v4199_v17, %v2475_v51 }
 0xbf7   : > { %v2593_v59 = vpop.f32.mrf.mxu0 }
 0xbf8   : > { %v2601_v60 = vmul.f32 %v4193_v57, %v2593_v59 }
 0xbf9   : > { %v3779_v61 = vpop.f32.mrf.mxu0 }
 0xbfa   : > { %2825 = vrot.lane.b32.xlu1 %v2601_v60, %s4933_s18  ;;  %s3104_s18 = sshll.u32 %s5577_s5, 4  ;;  %s3105_s18 = int_to_ptr.vmem [resolvable:$true] %s3104_s18 }
 0xbfb   : > { %v2596_v62 = vpop.f32.mrf.mxu0  ;;  %p4729_p2 = scmp.lt.s32.totalorder %s3105_s18, %s4727_s28 }
 0xbfd   : > { %v3780_v0 = vpop.f32.mrf.mxu0 }
 0xbff   : > { %v2704_v3 = vpop.f32.mrf.mxu0 }
 0xc00   : > { %v2712_v4 = vmul.f32 %v4195_v1, %v2704_v3 }
 0xc01   : > { %v3791_v5 = vpop.f32.mrf.mxu0 }
 0xc02   : > { %2829 = vrot.lane.b32.xlu0 %v2712_v4, %s4934_s3  ;;  %s3076_s3 = scalar_lea.sflag [#allocation40], %s5569_s2 }
 0xc03   : > { %v2707_v6 = vpop.f32.mrf.mxu0 }
 0xc05   : > { %v3792_v7 = vpop.f32.mrf.mxu0 }
 0xc07   : > { %v2815_v9 = vpop.f32.mrf.mxu0 }
 0xc08   : > { %v2823_v10 = vmul.f32 %v4197_v8, %v2815_v9 }
 0xc09   : > { %v3803_v11 = vpop.f32.mrf.mxu0 }
 0xc0a   : > { %2833 = vrot.lane.b32.xlu1 %v2823_v10, %s4935_s4  ;;  %s4722_s4 = scalar_lea.vmem %s3105_s18, 128 }
 0xc0b   : > { %v2818_v13 = vpop.f32.mrf.mxu0  ;;  %p4723_p0 = scmp.ne.s32.totalorder %s3105_s18, %s4722_s4  ;;  %p4730_p3 = scmp.lt.s32.totalorder %s4728_s16, %s4722_s4 }
 0xc0d   : > { %v3804_v14 = vpop.f32.mrf.mxu0  ;;  %p4724_p12 = pnand %p4723_p0, %p5736_p9  ;;  %p4731_p8 = por %p4730_p3, %p4729_p2 }
 0xc0f   : > { %p4725_p1 = pneg %p4724_p12 }
 0xc11   : > { %p4732_p5 = pnand %p4731_p8, %p4725_p1 }
 0xc6c   : > { %v2826_v18 = vpop.permute.xlu1 %2825 }
 0xc6d   : > { %v2836_v21 = vsel %vm1754_vm4, %v2483_v19, %v2826_v18 }
 0xc74   : > { %v2830_v20 = vpop.permute.xlu0 %2829 }
 0xc75   : > { %v2837_v22 = vsel %vm2215_vm6, %v2836_v21, %v2830_v20 }
 0xc7c   : > { %v2834_v2 = vpop.permute.xlu1 %2833 }
 0xc7d   : > { %v2838_v23 = vsel %vm2217_vm7, %v2837_v22, %v2834_v2 }
 0xc7e   : > { %v2839_v24 = vpack.c.bf16 %v2838_v23, %v2838_v23 }
 0xc80   : > { %3810 = vmatmul.mubr.msk.bf16.vlgmr.msra.gmra.mxu1 %vm1391_vm0, %v2839_v24 }
 0xc81   : > { %3829 = vmatprep.mubr.msk.bf16.mxu1 %vm4928_vm1, %v4927_v15  ;;  %3822 = vmatpush3.bf16.msra.mxu1 %v4158_v40 }
 0xc82   : > { %3823 = vmatprep.subr.bf16.mxu1 %v4927_v15 }
 0xc85   : > { %3824 = vmatpush3.bf16.msra.mxu1 %v4159_v41 }
 0xc86   : > { %3825 = vmatprep.subr.bf16.mxu1 %v4927_v15 }
 0xc89   : > { %3826 = vmatpush3.bf16.msra.mxu1 %v4160_v52 }
 0xc8a   : > { %3827 = vmatprep.subr.bf16.mxu1 %v4927_v15 }
 0xc8d   : > { %3828 = vmatpush3.bf16.msra.mxu1 %v4161_v53 }
 0xd40   : > { %v2895_v26 = vpop.f32.mrf.mxu1 }
 0xd41   : > { %v2896_v27 = vadd.f32 %v3565_v25, %v2895_v26 }
 0xd42   : > { %v3811_v28 = vpop.f32.mrf.mxu1 }
 0xd43   : > { %v5573_v29 = vadd.f32 %v2896_v27, %v5481_v12  ;;  %3069 = vst.msk [vmem:[%s5577_s5] sm:$0xff] %vm1391_vm0, %v2896_v27 }
 0xd44   : > { %v2898_v30 = vpop.f32.mrf.mxu1 }
 0xd45   : > { %v2902_v31 = vsel %vm1391_vm0, %v5573_v29, 0.0 }
 0xd46   : > { %2903 = vadd.xlane.f32.xlu1 %v2902_v31  ;;  %v3812_v32 = vpop.f32.mrf.mxu1 }
 0xdcf   : > { %v2904_v33 = vpop.xlane.xlu1 %2903 }
 0xdd0   : > { %v2905_v35 = vmul.f32 0.03125, %v2904_v33 }
 0xdd2   : > { %v2906_v36 = vsub.f32 %v5573_v29, %v2905_v35 }
 0xdd4   : > { %v2907_v12 = vmul.f32 %v2906_v36, %v2906_v36 }
 0xdd6   : > { %v2908_v37 = vsel %vm1391_vm0, %v2907_v12, 0.0 }
 0xdd7   : > { %2909 = vadd.xlane.f32.xlu0 %v2908_v37 }
 0xe60   : > { %v2910_v42 = vpop.xlane.xlu0 %2909 }
 0xe61   : > { %v2911_v43 = vmul.f32 0.03125, %v2910_v42 }
 0xe63   : > { %v2912_v44 = vadd.f32 1e-06, %v2911_v43 }
 0xe65   : > { %4200 = vrsqrt.f32 %v2912_v44 }
 0xe72   : > { %v4201_v45 = vpop.eup %4200 }
 0xe73   : > { %v2914_v47 = vmul.f32 %v4201_v45, %v2906_v36 }
 0xe75   : > { %v2921_v49 = vmul.f32 %v3569_v46, %v2914_v47 }
 0xe77   : > { %v2928_v50 = vadd.f32 %v3570_v48, %v2921_v49 }
 0xe79   : > { %v2929_v51 = vpack.c.bf16 %v2928_v50, %v2928_v50 }
 0xe7b   : > { %3818 = vmatmul.mubr.msk.bf16.vlgmr.msra.gmra.mxu0 %vm1391_vm0, %v2929_v51 }
 0xf3b   : > { %v2985_v54 = vpop.f32.mrf.mxu0 }
 0xf3c   : > { %v2986_v55 = vadd.f32 %v3571_v34, %v2985_v54 }
 0xf3d   : > { %v3819_v56 = vpop.f32.mrf.mxu0 }
 0xf3e   : > { %v2991_v57 = vmax.f32 %v2986_v55, 0.0 }
 0xf3f   : > { %v2988_v58 = vpop.f32.mrf.mxu0 }
 0xf40   : > { %v2992_v59 = vpack.c.bf16 %v2991_v57, %v2991_v57 }
 0xf41   : > { %v3820_v60 = vpop.f32.mrf.mxu0 }
 0xf42   : > { %3830 = vmatmul.mubr.msk.bf16.vlgmr.msra.gmra.mxu1 %vm3023_vm8, %v2992_v59 }
 0xf43   : > { %4735 = shalt.err (!%p4732_p5)
}
 0xf44   : > { %s4736_s6 = scalar_lea.hbm %s3102_s10, 128  ;;  %s4740_s5 = scalar_lea.hbm %s5101_s20, 256 }
 0xf45   : > { %p4737_p6 = scmp.ne.s32.totalorder %s3102_s10, %s4736_s6  ;;  %p4741_p4 = scmp.lt.s32.totalorder %s3102_s10, %s5101_s20 }
 0xf46   : > { %p4742_p10 = scmp.lt.s32.totalorder %s4740_s5, %s4736_s6 }
 0xf47   : > { %p4738_p7 = pnand %p4737_p6, %p5736_p9 }
 0xf48   : > { %p4743_p13 = por %p4742_p10, %p4741_p4 }
 0xf49   : > { %p4739_p11 = pneg %p4738_p7 }
 0xf4b   : > { %p4744_p0 = pnand %p4743_p13, %p4739_p11 }
 0xf4d   : > { %4747 = shalt.err (!%p4744_p0)
}
 0xf4e   : > { %s5737_s4 = sld [smem:[#allocation72_spill]]  ;;  %s1277_s28 = scalar_lea.vmem [#allocation38], %s3510_s0 }
 0xf4f   : > { %s5738_s22 = sld [smem:[#allocation73_spill]]  ;;  %s3090_s7 = sshll.u32 %s1277_s28, 4  ;;  %s5620_s7 = int_to_ptr.vmem [resolvable:$true] %s3090_s7 }
 0xf50   : > { %3914 = dma.vmem_to_hbm [thread:$0]  (%p5736_p9), %s3105_s18, 128, %s3102_s10, %s3076_s3  }
 0xf51   : > { %s5740_s6 = sshll.u32 %s4864_s26, 7  ;;  %s3071_s10 = scalar_lea.sflag [#allocation8], %s5569_s2 }
 0xf52   : > { %s4748_s18 = scalar_lea.vmem %s5620_s7, 128  ;;  %s4937_s0 = smov [#allocation38]  }
 0xf53   : > { %p4749_p12 = scmp.ne.s32.totalorder %s5620_s7, %s4748_s18  ;;  %s4752_s3 = sshll.u32 %s4937_s0, 4  ;;  %s4753_s3 = int_to_ptr.vmem [resolvable:$false] %s4752_s3 }
 0xf54   : > { %v3575_v15 = vld [vmem:[%s5737_s4] ss:$0 sm:$0xff]  ;;  %s4754_s26 = scalar_lea.vmem %s4753_s3, 256  ;;  %p4755_p3 = scmp.lt.s32.totalorder %s5620_s7, %s4753_s3 }
 0xf55   : > { %s5739_s16 = smov %s5738_s22  ;;  %s5618_s5 = scalar_lea.hbm %s5738_s22, %s5740_s6 }
 0xf56   : > { %p4750_p1 = pnand %p4749_p12, %p5736_p9  ;;  %p4756_p8 = scmp.lt.s32.totalorder %s4754_s26, %s4748_s18 }
 0xf58   : > { %p4751_p2 = pneg %p4750_p1  ;;  %p4757_p5 = por %p4756_p8, %p4755_p3 }
 0xf5a   : > { %p4758_p6 = pnand %p4757_p5, %p4751_p2 }
0x1002   : > { %v3061_v61 = vpop.f32.mrf.mxu1 }
0x1003   : > { %v3062_v62 = vadd.f32 %v3575_v15, %v3061_v61 }
0x1004   : > { %v3831_v63 = vpop.f32.mrf.mxu1 }
0x1005   : > { %v3067_v0 = vadd.f32 %v3062_v62, %v5573_v29 }
0x1006   : > { %v3064_v1 = vpop.f32.mrf.mxu1 }
0x1007   : > { %3068 = vst.msk [vmem:[%s1277_s28] sm:$0xff] %vm1391_vm0, %v3067_v0 }
0x1008   : > { %v3832_v3 = vpop.f32.mrf.mxu1 }
0x1009   : > { %4761 = shalt.err (!%p4758_p6)
}
0x100a   : > { %s4762_s2 = scalar_lea.hbm %s5618_s5, 128  ;;  %s4766_s4 = scalar_lea.hbm %s5739_s16, 256 }
0x100b   : > { %p4763_p7 = scmp.ne.s32.totalorder %s5618_s5, %s4762_s2  ;;  %p4767_p10 = scmp.lt.s32.totalorder %s5618_s5, %s5739_s16 }
0x100c   : > { %p4768_p13 = scmp.lt.s32.totalorder %s4766_s4, %s4762_s2 }
0x100d   : > { %p4764_p11 = pnand %p4763_p7, %p5736_p9 }
0x100e   : > { %p4769_p0 = por %p4768_p13, %p4767_p10 }
0x100f   : > { %p4765_p4 = pneg %p4764_p11 }
0x1011   : > { %p4770_p12 = pnand %p4769_p0, %p4765_p4 }
0x1013   : > { %4773 = shalt.err (!%p4770_p12)
}
0x1014   : > { %3913 = dma.vmem_to_hbm [thread:$0]  (%p5736_p9), %s5620_s7, 128, %s5618_s5, %s3071_s10  }
0x1015 PF: > { %s5741_s22 = sld [smem:[#allocation74_spill]]  ;;  %p4025_p1 = scmp.ge.s32.totalorder %s4872_s1, 2 }
0x1016   : > { %s5742_s28 = sld [smem:[#allocation78_spill]] }
0x101b   : > { %s3116_s6 = sand.u32 1, %s5741_s22  }
0x101c   : > { %p5743_p2 = scmp.ne.s32.totalorder %s5742_s28, 0  ;;  %s3117_s18 = scalar_lea.sflag [#allocation8], %s3116_s6 }
0x101e   : > { %p3979_p3 = pnand %p4025_p1, %p5743_p2 }
0x1020   : > { %p3980_p8 = pneg %p3979_p3 }
0x1022   : > { %4843 = dma.done.wait (%p3980_p8), %s3117_s18, 128  }
0x1023   : > { %4845 = vsyncadd (%p3980_p8), %s3117_s18, 4294967168  ;;  %s3126_s0 = scalar_lea.sflag [#allocation40], %s3116_s6 }
0x1024   : > { %4847 = dma.done.wait (%p3980_p8), %s3126_s0, 128  }
0x1025   : > { %4849 = vsyncadd (%p3980_p8), %s3126_s0, 4294967168  ;;  %s91_s1 = sadd.s32 1, %s4872_s1   ;;  %s5744_s15 = sld [smem:[#allocation75_spill]] }
0x1026   : > { %p88_p5 = scmp.ge.s32.totalorder %s91_s1, 4   ;;  %s5745_s0 = sld [smem:[#allocation79_spill]] }
0x1027   : > { %s5746_s26 = sld [smem:[#allocation76_spill]]  ;;  %s5748_s22 = smov %s4856_s23 }
0x1028   : > { %s5747_s28 = sld [smem:[#allocation77_spill]]  ;;  %90 = sbr.rel (!%p88_p5) target bundleno = 73 (0x49), region = 317 }
0x102b   : > { %s5749_s23 = smov %s5744_s15 }
0x102d   :  { %3131 = vsyncpa [#allocation7], 1 }
0x102e   :  { %3133 = vsyncpa [#allocation7 + $0x1], 1 }
0x102f   :  { %3134 = vsyncpa [#allocation10], 1 }
0x1030   :  { %3135 = vsyncpa [#allocation13], 1 }
0x1031   :  { %3136 = vsyncpa [#allocation16], 1 }
0x1032   :  { %3137 = vsyncpa [#allocation19], 1 }
0x1033   :  { %3138 = vsyncpa [#allocation22], 1 }
0x1034   :  { %3139 = vsyncpa [#allocation25], 1 }
0x1035   :  { %3140 = vsyncpa [#allocation28], 1 }
0x1036   :  { %3141 = vsyncpa [#allocation31], 1 }
0x1037   :  { %3142 = vsyncpa [#allocation34], 1 }
0x1038   :  { %3143 = vsyncpa [#allocation37], 1 }
0x1039   :  { %3144 = vsyncpa [#allocation8], 1 }
0x103a   :  { %3146 = vsyncpa [#allocation8 + $0x1], 1 }
0x103b   :  { %3147 = vsyncpa [#allocation40], 1 }
0x103c   :  { %3149 = vsyncpa [#allocation40 + $0x1], 1 }

</bundles_post_ra>
